<compile_context>
chip_gen: v7x
topology: tpu7x:2x2x1
jax: 0.10.0
libtpu: 0.0.40
codegen_flags: <defaults>
</compile_context>

<pallas_src>
import math
import functools

import jax
import jax.numpy as jnp
from jax import lax
from jax.experimental import pallas as pl
from jax.experimental.pallas import tpu as pltpu

# ---------------- synthetic CLIP-vision config (small) ----------------
IMG      = 16          # input / model image size (resize step skipped)
PATCH    = 8
CHANNELS = 3
HIDDEN   = 32          # hidden_size -> emb_dim
HEADS    = 4
HEAD_DIM = HIDDEN // HEADS
MLP_DIM  = 64
LAYERS   = 2
NUM_PATCHES = (IMG // PATCH) ** 2          # 4
SEQ      = NUM_PATCHES + 1                 # 5 (CLS + patches)
S_PAD    = 8                               # sequence padded to the 8-sublane granule
EPS      = 1e-5
PATCH_FLAT = CHANNELS * PATCH * PATCH      # 192

CLIP_MEAN = jnp.array([0.48145466, 0.4578275, 0.40821073], dtype=jnp.float32)
CLIP_STD  = jnp.array([0.26862954, 0.26130258, 0.27577711], dtype=jnp.float32)


# ---------------- in-kernel helpers ----------------
def _layernorm(x, g, b):
    mu = jnp.mean(x, axis=-1, keepdims=True)
    var = jnp.mean((x - mu) ** 2, axis=-1, keepdims=True)
    return (x - mu) * lax.rsqrt(var + EPS) * g + b


# ---------------- fused Pallas kernel ----------------
def clip_encoder_kernel(B,
                        patches_ref, base_ref, patch_w_ref,
                        pre_g_ref, pre_b_ref,
                        ln1_g_ref, ln1_b_ref, wqkv_ref, bqkv_ref, wo_ref, bo_ref,
                        ln2_g_ref, ln2_b_ref, w1_ref, b1_ref, w2_ref, b2_ref,
                        post_g_ref, post_b_ref,
                        hidden_ref, pooled_ref):
    R = B * S_PAD
    scale = 1.0 / math.sqrt(HEAD_DIM)

    # Additive attention-mask bias, hoisted once.  Batch is folded into rows, so
    # scores are computed on the full [R, R] slab; allowed iff (same image block)
    # AND (key position < SEQ).  Pad KEY positions never contribute; pad QUERY
    # rows produce finite garbage that the wrapper drops.
    shift = S_PAD.bit_length() - 1                       # S_PAD == 8 -> 3
    ri = lax.broadcasted_iota(jnp.int32, (R, R), 0)
    ci = lax.broadcasted_iota(jnp.int32, (R, R), 1)
    ok = ((ri >> shift) == (ci >> shift)) & ((ci & (S_PAD - 1)) < SEQ)
    mask_bias = jnp.where(ok, jnp.float32(0.0), jnp.float32(-1e30))   # [R, R]

    # ---- patch embedding (CLIP 1/255 rescale + mean/std normalize folded into
    #      patch_w / base); bf16 operands, f32 accumulation ----
    h = jnp.dot(patches_ref[...], patch_w_ref[...],
                preferred_element_type=jnp.float32)                    # [R, D] f32
    base = jnp.broadcast_to(base_ref[...][None],
                            (B, S_PAD, HIDDEN)).reshape(R, HIDDEN)     # hoisted once
    h = h + base
    h = _layernorm(h, pre_g_ref[...], pre_b_ref[...])

    # ---- layer loop fully unrolled; all weights VMEM-resident (<50 KB total) ----
    for li in range(LAYERS):
        # ----- self-attention block: h = h + Attn(LN1(h)) -----
        x = _layernorm(h, ln1_g_ref[li], ln1_b_ref[li])                # [R, D] f32
        qkv = jnp.dot(x.astype(jnp.bfloat16), wqkv_ref[li],
                      preferred_element_type=jnp.float32) + bqkv_ref[li]   # [R, 3D]
        q = qkv[:, :HIDDEN] * scale
        k = qkv[:, HIDDEN:2 * HIDDEN]
        v = qkv[:, 2 * HIDDEN:]

        ctx_heads = []
        for hh in range(HEADS):                                        # static, 4 heads
            sl = slice(hh * HEAD_DIM, (hh + 1) * HEAD_DIM)
            s = jnp.einsum('qe,ke->qk', q[:, sl], k[:, sl],
                           preferred_element_type=jnp.float32) + mask_bias  # [R, R]
            s = s - jnp.max(s, axis=-1, keepdims=True)
            p = jnp.exp(s)
            p = p / jnp.sum(p, axis=-1, keepdims=True)
            ctx_heads.append(jnp.dot(p, v[:, sl],
                                     preferred_element_type=jnp.float32))   # [R, hd]
        # heads are lane-contiguous -> one K=32 output projection
        ctx = jnp.concatenate(ctx_heads, axis=-1)                      # [R, D]
        attn = jnp.dot(ctx.astype(jnp.bfloat16), wo_ref[li],
                       preferred_element_type=jnp.float32) + bo_ref[li]
        h = h + attn

        # ----- MLP block: h = h + MLP(LN2(h)), quick_gelu (f32 elementwise) -----
        x = _layernorm(h, ln2_g_ref[li], ln2_b_ref[li])
        y = jnp.dot(x.astype(jnp.bfloat16), w1_ref[li],
                    preferred_element_type=jnp.float32) + b1_ref[li]
        y = y * jax.nn.sigmoid(1.702 * y)                              # quick_gelu
        y = jnp.dot(y.astype(jnp.bfloat16), w2_ref[li],
                    preferred_element_type=jnp.float32) + b2_ref[li]
        h = h + y

    hidden_ref[...] = h                                                # padded last_hidden_state
    cls = h.reshape(B, S_PAD, HIDDEN)[:, 0, :]                         # [B, D] sublane gather
    pooled_ref[...] = _layernorm(cls, post_g_ref[...], post_b_ref[...])


# ---------------- parameter init (deterministic, synthetic) ----------------
def init_params(key):
    def nrm(k, shape, scale=0.02):
        return scale * jax.random.normal(k, shape, dtype=jnp.float32)

    keys = jax.random.split(key, 4 + LAYERS)
    params = {
        # patch conv weight flattened to [C*ps*ps, D] (torch [D, C, ps, ps] -> .reshape(D,-1).T)
        "patch_w":   nrm(keys[0], (PATCH_FLAT, HIDDEN)),
        "class_emb": nrm(keys[1], (HIDDEN,)),
        "pos_emb":   nrm(keys[2], (SEQ, HIDDEN)),
        "pre_ln_g":  jnp.ones((1, HIDDEN), jnp.float32),
        "pre_ln_b":  jnp.zeros((1, HIDDEN), jnp.float32),
        "post_ln_g": jnp.ones((1, HIDDEN), jnp.float32),
        "post_ln_b": jnp.zeros((1, HIDDEN), jnp.float32),
        "layers":    [],
    }
    for li in range(LAYERS):
        lk = jax.random.split(keys[4 + li], 6)
        params["layers"].append({
            "ln1_g": jnp.ones((1, HIDDEN), jnp.float32),
            "ln1_b": jnp.zeros((1, HIDDEN), jnp.float32),
            "wq": nrm(lk[0], (HIDDEN, HIDDEN)), "bq": jnp.zeros((1, HIDDEN), jnp.float32),
            "wk": nrm(lk[1], (HIDDEN, HIDDEN)), "bk": jnp.zeros((1, HIDDEN), jnp.float32),
            "wv": nrm(lk[2], (HIDDEN, HIDDEN)), "bv": jnp.zeros((1, HIDDEN), jnp.float32),
            "wo": nrm(lk[3], (HIDDEN, HIDDEN)), "bo": jnp.zeros((1, HIDDEN), jnp.float32),
            "ln2_g": jnp.ones((1, HIDDEN), jnp.float32),
            "ln2_b": jnp.zeros((1, HIDDEN), jnp.float32),
            "w1": nrm(lk[4], (HIDDEN, MLP_DIM)), "b1": jnp.zeros((1, MLP_DIM), jnp.float32),
            "w2": nrm(lk[5], (MLP_DIM, HIDDEN)), "b2": jnp.zeros((1, HIDDEN), jnp.float32),
        })
    return params


def prepare_kernel_params(params):
    """Repack params into fused, kernel-ready arrays (done once, outside the kernel)."""
    # Fold 1/255 rescale and CLIP (x-mean)/std normalization into the patch matmul:
    #   emb = xq @ (W / (255*std_per_row)) - (mean/std per row) @ W
    std_rows = jnp.repeat(CLIP_STD, PATCH * PATCH)             # row order = (c, py, px)
    mean_rows = jnp.repeat(CLIP_MEAN, PATCH * PATCH)
    w = params["patch_w"]                                      # [PATCH_FLAT, D]
    patch_w = w / (255.0 * std_rows)[:, None]
    patch_b = -jnp.dot(mean_rows / std_rows, w)                # [D]

    # Base embedding slab [S_PAD, D]: CLS row = class_emb + pos[0];
    # patch rows = pos[1:] + folded normalization bias; pad rows = 0.
    base = jnp.zeros((S_PAD, HIDDEN), jnp.float32)
    base = base.at[0].set(params["class_emb"] + params["pos_emb"][0])
    base = base.at[1:SEQ].set(params["pos_emb"][1:] + patch_b[None, :])

    # NOTE: synthetic weights are stored input-major ([D_in, D_out], applied as
    # x @ W).  Real torch nn.Linear stores [out, in]; transpose here when porting.
    ln1g, ln1b, ln2g, ln2b = [], [], [], []
    wqkv, bqkv, wo, bo = [], [], [], []
    w1, b1, w2l, b2 = [], [], [], []
    for lp in params["layers"]:
        wqkv.append(jnp.concatenate([lp["wq"], lp["wk"], lp["wv"]], axis=1))   # [D, 3D]
        bqkv.append(jnp.concatenate([lp["bq"], lp["bk"], lp["bv"]], axis=1))   # [1, 3D]
        wo.append(lp["wo"]); bo.append(lp["bo"])
        ln1g.append(lp["ln1_g"]); ln1b.append(lp["ln1_b"])
        ln2g.append(lp["ln2_g"]); ln2b.append(lp["ln2_b"])
        w1.append(lp["w1"]); b1.append(lp["b1"])
        w2l.append(lp["w2"]); b2.append(lp["b2"])

    bf16 = jnp.bfloat16
    return {
        "patch_w": patch_w.astype(bf16),                       # [PATCH_FLAT, D]
        "base": base,                                          # [S_PAD, D] f32
        "pre_g": params["pre_ln_g"], "pre_b": params["pre_ln_b"],
        "post_g": params["post_ln_g"], "post_b": params["post_ln_b"],
        "ln1_g": jnp.stack(ln1g), "ln1_b": jnp.stack(ln1b),    # [L, 1, D]
        "ln2_g": jnp.stack(ln2g), "ln2_b": jnp.stack(ln2b),    # [L, 1, D]
        "wqkv": jnp.stack(wqkv).astype(bf16),                  # [L, D, 3D]
        "bqkv": jnp.stack(bqkv),                               # [L, 1, 3D]
        "wo": jnp.stack(wo).astype(bf16),                      # [L, D, D]
        "bo": jnp.stack(bo),                                   # [L, 1, D]
        "w1": jnp.stack(w1).astype(bf16), "b1": jnp.stack(b1), # [L, D, M], [L, 1, M]
        "w2": jnp.stack(w2l).astype(bf16), "b2": jnp.stack(b2),# [L, M, D], [L, 1, D]
    }


# ---------------- forward (mirrors CLIPEncoder.forward) ----------------
def clip_encoder_forward(x, fused, feature_key="pooler_output"):
    # x: [B, 3, H, W] float32 in [0, 1] (NCHW, like the torch module input)
    B = x.shape[0]

    # torch: (x*255).numpy().astype('uint8') truncates; keep that round-trip exactly.
    # The processor's 1/255 rescale + CLIP mean/std normalize are folded into
    # patch_w / base, so the kernel consumes raw 0..255 pixel values (exact in bf16).
    # TODO(synk): CLIPProcessor's PIL resize/center-crop to 224 has no Pallas
    #             equivalent; input is assumed to already be at IMG x IMG.
    xq = (x * 255.0).astype(jnp.uint8).astype(jnp.float32)

    # flatten stride-PATCH patches (layout plumbing, wrapper-side):
    # row b*S_PAD + 0 (CLS) and pad rows are zero; patch rows hold flattened pixels.
    nH = IMG // PATCH
    patches = xq.reshape(B, CHANNELS, nH, PATCH, nH, PATCH)
    patches = patches.transpose(0, 2, 4, 1, 3, 5).reshape(B, NUM_PATCHES, PATCH_FLAT)
    patches_full = jnp.zeros((B, S_PAD, PATCH_FLAT), jnp.float32)
    patches_full = patches_full.at[:, 1:SEQ, :].set(patches)
    patches_full = patches_full.reshape(B * S_PAD, PATCH_FLAT).astype(jnp.bfloat16)

    hidden, pooled = pl.pallas_call(
        functools.partial(clip_encoder_kernel, B),
        out_shape=(jax.ShapeDtypeStruct((B * S_PAD, HIDDEN), jnp.float32),
                   jax.ShapeDtypeStruct((B, HIDDEN), jnp.float32)),
        compiler_params=pltpu.CompilerParams(vmem_limit_bytes=32 * 1024 * 1024),
    )(patches_full, fused["base"], fused["patch_w"],
      fused["pre_g"], fused["pre_b"],
      fused["ln1_g"], fused["ln1_b"], fused["wqkv"], fused["bqkv"],
      fused["wo"], fused["bo"],
      fused["ln2_g"], fused["ln2_b"], fused["w1"], fused["b1"],
      fused["w2"], fused["b2"],
      fused["post_g"], fused["post_b"])

    if feature_key == "pooler_output":
        emb = pooled                                            # [B, D]
    elif feature_key == "last_hidden_state":
        emb = hidden.reshape(B, S_PAD, HIDDEN)[:, :SEQ, :]      # drop pad rows
    else:
        raise ValueError(f"Invalid feature key: {feature_key}")

    # latent_ndim == 1  ->  unsqueeze(1)
    return emb[:, None]


if __name__ == "__main__":
    key = jax.random.PRNGKey(0)
    pkey, xkey = jax.random.split(key)
    params = init_params(pkey)
    fused = prepare_kernel_params(params)

    x = jax.random.uniform(xkey, (2, CHANNELS, IMG, IMG), dtype=jnp.float32)  # [B,3,16,16] in [0,1]

    fwd = jax.jit(functools.partial(clip_encoder_forward, feature_key="pooler_output"))
    out = fwd(x, fused)
    out = jax.block_until_ready(out)

    assert out.shape == (2, 1, HIDDEN), out.shape
    assert out.dtype == jnp.float32
    assert bool(jnp.all(jnp.isfinite(out)))
    print("KERNEL_OK")
</pallas_src>

<mosaic_0001>
module attributes {stable_mosaic.version = 11 : i64} {
  func.func @clip_encoder_kernel(%arg0: memref<16x192xbf16, #tpu.memory_space<vmem>>, %arg1: memref<8x32xf32, #tpu.memory_space<vmem>>, %arg2: memref<192x32xbf16, #tpu.memory_space<vmem>>, %arg3: memref<1x32xf32, #tpu.memory_space<vmem>>, %arg4: memref<1x32xf32, #tpu.memory_space<vmem>>, %arg5: memref<2x1x32xf32, #tpu.memory_space<vmem>>, %arg6: memref<2x1x32xf32, #tpu.memory_space<vmem>>, %arg7: memref<2x32x96xbf16, #tpu.memory_space<vmem>>, %arg8: memref<2x1x96xf32, #tpu.memory_space<vmem>>, %arg9: memref<2x32x32xbf16, #tpu.memory_space<vmem>>, %arg10: memref<2x1x32xf32, #tpu.memory_space<vmem>>, %arg11: memref<2x1x32xf32, #tpu.memory_space<vmem>>, %arg12: memref<2x1x32xf32, #tpu.memory_space<vmem>>, %arg13: memref<2x32x64xbf16, #tpu.memory_space<vmem>>, %arg14: memref<2x1x64xf32, #tpu.memory_space<vmem>>, %arg15: memref<2x64x32xbf16, #tpu.memory_space<vmem>>, %arg16: memref<2x1x32xf32, #tpu.memory_space<vmem>>, %arg17: memref<1x32xf32, #tpu.memory_space<vmem>>, %arg18: memref<1x32xf32, #tpu.memory_space<vmem>>, %arg19: memref<16x32xf32, #tpu.memory_space<vmem>>, %arg20: memref<2x32xf32, #tpu.memory_space<vmem>>) attributes {dimension_semantics = [], scalar_prefetch = 0 : i64, scratch_operands = 0 : i64, tpu.core_type = #tpu.core_type<tc>} {
    %0 = tpu.iota {dimensions = array<i32: 0>} : vector<16x16xi32>
    %1 = tpu.iota {dimensions = array<i32: 1>} : vector<16x16xi32>
    %c3_i32 = arith.constant 3 : i32
    %2 = vector.broadcast %c3_i32 : i32 to vector<16x16xi32>
    %3 = arith.shrsi %0, %2 : vector<16x16xi32>
    %c3_i32_0 = arith.constant 3 : i32
    %4 = vector.broadcast %c3_i32_0 : i32 to vector<16x16xi32>
    %5 = arith.shrsi %1, %4 : vector<16x16xi32>
    %6 = arith.cmpi eq, %3, %5 : vector<16x16xi32>
    %c7_i32 = arith.constant 7 : i32
    %7 = vector.broadcast %c7_i32 : i32 to vector<16x16xi32>
    %8 = arith.andi %1, %7 : vector<16x16xi32>
    %c5_i32 = arith.constant 5 : i32
    %9 = vector.broadcast %c5_i32 : i32 to vector<16x16xi32>
    %10 = arith.cmpi slt, %8, %9 : vector<16x16xi32>
    %11 = arith.andi %6, %10 : vector<16x16xi1>
    %cst = arith.constant 0.000000e+00 : f32
    %cst_1 = arith.constant -1.000000e+30 : f32
    %12 = vector.broadcast %cst : f32 to vector<16x16xf32>
    %13 = vector.broadcast %cst_1 : f32 to vector<16x16xf32>
    %14 = arith.select %11, %12, %13 : vector<16x16xi1>, vector<16x16xf32>
    %c0 = arith.constant 0 : index
    %c0_2 = arith.constant 0 : index
    %15 = vector.load %arg0[%c0, %c0_2] : memref<16x192xbf16, #tpu.memory_space<vmem>>, vector<16x192xbf16>
    %c0_3 = arith.constant 0 : index
    %c0_4 = arith.constant 0 : index
    %16 = vector.load %arg2[%c0_3, %c0_4] : memref<192x32xbf16, #tpu.memory_space<vmem>>, vector<192x32xbf16>
    %cst_5 = arith.constant dense<0.000000e+00> : vector<16x32xf32>
    %17 = tpu.matmul %15, %16, %cst_5 {dimension_numbers = #tpu.dot_dimension_numbers<[1], [0], [0], [1], [0, 0, 1, 1], [], []>} : vector<16x192xbf16>, vector<192x32xbf16>, vector<16x32xf32> -> vector<16x32xf32>
    %c0_6 = arith.constant 0 : index
    %c0_7 = arith.constant 0 : index
    %18 = vector.load %arg1[%c0_6, %c0_7] : memref<8x32xf32, #tpu.memory_space<vmem>>, vector<8x32xf32>
    %19 = vector.shape_cast %18 : vector<8x32xf32> to vector<1x8x32xf32>
    %20 = vector.shape_cast %19 : vector<1x8x32xf32> to vector<1x8x32xf32>
    %21 = vector.broadcast %20 : vector<1x8x32xf32> to vector<2x8x32xf32>
    %22 = vector.shape_cast %21 : vector<2x8x32xf32> to vector<16x32xf32>
    %23 = arith.addf %17, %22 : vector<16x32xf32>
    %c0_8 = arith.constant 0 : index
    %c0_9 = arith.constant 0 : index
    %24 = vector.load %arg3[%c0_8, %c0_9] : memref<1x32xf32, #tpu.memory_space<vmem>>, vector<1x32xf32>
    %c0_10 = arith.constant 0 : index
    %c0_11 = arith.constant 0 : index
    %25 = vector.load %arg4[%c0_10, %c0_11] : memref<1x32xf32, #tpu.memory_space<vmem>>, vector<1x32xf32>
    %cst_12 = arith.constant dense<0.000000e+00> : vector<16xf32>
    %26 = vector.multi_reduction <add>, %23, %cst_12 [1] : vector<16x32xf32> to vector<16xf32>
    %27 = vector.shape_cast %26 : vector<16xf32> to vector<16x1xf32>
    %cst_13 = arith.constant 3.200000e+01 : f32
    %28 = vector.broadcast %cst_13 : f32 to vector<16x1xf32>
    %29 = arith.divf %27, %28 : vector<16x1xf32>
    %30 = vector.broadcast %29 : vector<16x1xf32> to vector<16x32xf32>
    %31 = arith.subf %23, %30 : vector<16x32xf32>
    %32 = arith.mulf %31, %31 : vector<16x32xf32>
    %cst_14 = arith.constant dense<0.000000e+00> : vector<16xf32>
    %33 = vector.multi_reduction <add>, %32, %cst_14 [1] : vector<16x32xf32> to vector<16xf32>
    %34 = vector.shape_cast %33 : vector<16xf32> to vector<16x1xf32>
    %cst_15 = arith.constant 3.200000e+01 : f32
    %35 = vector.broadcast %cst_15 : f32 to vector<16x1xf32>
    %36 = arith.divf %34, %35 : vector<16x1xf32>
    %37 = vector.broadcast %29 : vector<16x1xf32> to vector<16x32xf32>
    %38 = arith.subf %23, %37 : vector<16x32xf32>
    %cst_16 = arith.constant 9.99999974E-6 : f32
    %39 = vector.broadcast %cst_16 : f32 to vector<16x1xf32>
    %40 = arith.addf %36, %39 : vector<16x1xf32>
    %41 = math.rsqrt %40 : vector<16x1xf32>
    %42 = vector.broadcast %41 : vector<16x1xf32> to vector<16x32xf32>
    %43 = arith.mulf %38, %42 : vector<16x32xf32>
    %44 = vector.broadcast %24 : vector<1x32xf32> to vector<16x32xf32>
    %45 = arith.mulf %43, %44 : vector<16x32xf32>
    %46 = vector.broadcast %25 : vector<1x32xf32> to vector<16x32xf32>
    %47 = arith.addf %45, %46 : vector<16x32xf32>
    %c0_17 = arith.constant 0 : index
    %c0_18 = arith.constant 0 : index
    %c0_19 = arith.constant 0 : index
    %48 = vector.load %arg5[%c0_17, %c0_18, %c0_19] : memref<2x1x32xf32, #tpu.memory_space<vmem>>, vector<1x1x32xf32>
    %49 = vector.shape_cast %48 : vector<1x1x32xf32> to vector<1x32xf32>
    %c0_20 = arith.constant 0 : index
    %c0_21 = arith.constant 0 : index
    %c0_22 = arith.constant 0 : index
    %50 = vector.load %arg6[%c0_20, %c0_21, %c0_22] : memref<2x1x32xf32, #tpu.memory_space<vmem>>, vector<1x1x32xf32>
    %51 = vector.shape_cast %50 : vector<1x1x32xf32> to vector<1x32xf32>
    %cst_23 = arith.constant dense<0.000000e+00> : vector<16xf32>
    %52 = vector.multi_reduction <add>, %47, %cst_23 [1] : vector<16x32xf32> to vector<16xf32>
    %53 = vector.shape_cast %52 : vector<16xf32> to vector<16x1xf32>
    %cst_24 = arith.constant 3.200000e+01 : f32
    %54 = vector.broadcast %cst_24 : f32 to vector<16x1xf32>
    %55 = arith.divf %53, %54 : vector<16x1xf32>
    %56 = vector.broadcast %55 : vector<16x1xf32> to vector<16x32xf32>
    %57 = arith.subf %47, %56 : vector<16x32xf32>
    %58 = arith.mulf %57, %57 : vector<16x32xf32>
    %cst_25 = arith.constant dense<0.000000e+00> : vector<16xf32>
    %59 = vector.multi_reduction <add>, %58, %cst_25 [1] : vector<16x32xf32> to vector<16xf32>
    %60 = vector.shape_cast %59 : vector<16xf32> to vector<16x1xf32>
    %cst_26 = arith.constant 3.200000e+01 : f32
    %61 = vector.broadcast %cst_26 : f32 to vector<16x1xf32>
    %62 = arith.divf %60, %61 : vector<16x1xf32>
    %63 = vector.broadcast %55 : vector<16x1xf32> to vector<16x32xf32>
    %64 = arith.subf %47, %63 : vector<16x32xf32>
    %cst_27 = arith.constant 9.99999974E-6 : f32
    %65 = vector.broadcast %cst_27 : f32 to vector<16x1xf32>
    %66 = arith.addf %62, %65 : vector<16x1xf32>
    %67 = math.rsqrt %66 : vector<16x1xf32>
    %68 = vector.broadcast %67 : vector<16x1xf32> to vector<16x32xf32>
    %69 = arith.mulf %64, %68 : vector<16x32xf32>
    %70 = vector.broadcast %49 : vector<1x32xf32> to vector<16x32xf32>
    %71 = arith.mulf %69, %70 : vector<16x32xf32>
    %72 = vector.broadcast %51 : vector<1x32xf32> to vector<16x32xf32>
    %73 = arith.addf %71, %72 : vector<16x32xf32>
    %74 = arith.truncf %73 : vector<16x32xf32> to vector<16x32xbf16>
    %c0_28 = arith.constant 0 : index
    %c0_29 = arith.constant 0 : index
    %c0_30 = arith.constant 0 : index
    %75 = vector.load %arg7[%c0_28, %c0_29, %c0_30] : memref<2x32x96xbf16, #tpu.memory_space<vmem>>, vector<1x32x96xbf16>
    %76 = vector.shape_cast %75 : vector<1x32x96xbf16> to vector<32x96xbf16>
    %cst_31 = arith.constant dense<0.000000e+00> : vector<16x96xf32>
    %77 = tpu.matmul %74, %76, %cst_31 {dimension_numbers = #tpu.dot_dimension_numbers<[1], [0], [0], [1], [0, 0, 1, 1], [], []>} : vector<16x32xbf16>, vector<32x96xbf16>, vector<16x96xf32> -> vector<16x96xf32>
    %c0_32 = arith.constant 0 : index
    %c0_33 = arith.constant 0 : index
    %c0_34 = arith.constant 0 : index
    %78 = vector.load %arg8[%c0_32, %c0_33, %c0_34] : memref<2x1x96xf32, #tpu.memory_space<vmem>>, vector<1x1x96xf32>
    %79 = vector.shape_cast %78 : vector<1x1x96xf32> to vector<1x96xf32>
    %80 = vector.broadcast %79 : vector<1x96xf32> to vector<16x96xf32>
    %81 = arith.addf %77, %80 : vector<16x96xf32>
    %82 = vector.extract_strided_slice %81 {offsets = [0, 0], sizes = [16, 32], strides = [1, 1]} : vector<16x96xf32> to vector<16x32xf32>
    %cst_35 = arith.constant 0.353553385 : f32
    %83 = vector.broadcast %cst_35 : f32 to vector<16x32xf32>
    %84 = arith.mulf %82, %83 : vector<16x32xf32>
    %85 = vector.extract_strided_slice %81 {offsets = [0, 32], sizes = [16, 32], strides = [1, 1]} : vector<16x96xf32> to vector<16x32xf32>
    %86 = vector.extract_strided_slice %81 {offsets = [0, 64], sizes = [16, 32], strides = [1, 1]} : vector<16x96xf32> to vector<16x32xf32>
    %87 = vector.extract_strided_slice %84 {offsets = [0, 0], sizes = [16, 8], strides = [1, 1]} : vector<16x32xf32> to vector<16x8xf32>
    %88 = vector.extract_strided_slice %85 {offsets = [0, 0], sizes = [16, 8], strides = [1, 1]} : vector<16x32xf32> to vector<16x8xf32>
    "tpu.trace_start"() <{level = 10 : i32, message = "qe,ke->qk"}> : () -> ()
    %cst_36 = arith.constant dense<0.000000e+00> : vector<16x16xf32>
    %89 = tpu.matmul %87, %88, %cst_36 {dimension_numbers = #tpu.dot_dimension_numbers<[1], [1], [0], [0], [0, 0, 1, 0], [], []>} : vector<16x8xf32>, vector<16x8xf32>, vector<16x16xf32> -> vector<16x16xf32>
    "tpu.trace_stop"() : () -> ()
    %90 = arith.addf %89, %14 : vector<16x16xf32>
    %cst_37 = arith.constant dense<0xFF800000> : vector<16xf32>
    %91 = vector.multi_reduction <maximumf>, %90, %cst_37 [1] : vector<16x16xf32> to vector<16xf32>
    %92 = vector.shape_cast %91 : vector<16xf32> to vector<16x1xf32>
    %93 = vector.broadcast %92 : vector<16x1xf32> to vector<16x16xf32>
    %94 = arith.subf %90, %93 : vector<16x16xf32>
    %95 = math.exp %94 : vector<16x16xf32>
    %cst_38 = arith.constant dense<0.000000e+00> : vector<16xf32>
    %96 = vector.multi_reduction <add>, %95, %cst_38 [1] : vector<16x16xf32> to vector<16xf32>
    %97 = vector.shape_cast %96 : vector<16xf32> to vector<16x1xf32>
    %98 = vector.broadcast %97 : vector<16x1xf32> to vector<16x16xf32>
    %99 = arith.divf %95, %98 : vector<16x16xf32>
    %100 = vector.extract_strided_slice %86 {offsets = [0, 0], sizes = [16, 8], strides = [1, 1]} : vector<16x32xf32> to vector<16x8xf32>
    %cst_39 = arith.constant dense<0.000000e+00> : vector<16x8xf32>
    %101 = tpu.matmul %99, %100, %cst_39 {dimension_numbers = #tpu.dot_dimension_numbers<[1], [0], [0], [1], [0, 0, 1, 1], [], []>} : vector<16x16xf32>, vector<16x8xf32>, vector<16x8xf32> -> vector<16x8xf32>
    %102 = vector.extract_strided_slice %84 {offsets = [0, 8], sizes = [16, 8], strides = [1, 1]} : vector<16x32xf32> to vector<16x8xf32>
    %103 = vector.extract_strided_slice %85 {offsets = [0, 8], sizes = [16, 8], strides = [1, 1]} : vector<16x32xf32> to vector<16x8xf32>
    "tpu.trace_start"() <{level = 10 : i32, message = "qe,ke->qk"}> : () -> ()
    %cst_40 = arith.constant dense<0.000000e+00> : vector<16x16xf32>
    %104 = tpu.matmul %102, %103, %cst_40 {dimension_numbers = #tpu.dot_dimension_numbers<[1], [1], [0], [0], [0, 0, 1, 0], [], []>} : vector<16x8xf32>, vector<16x8xf32>, vector<16x16xf32> -> vector<16x16xf32>
    "tpu.trace_stop"() : () -> ()
    %105 = arith.addf %104, %14 : vector<16x16xf32>
    %cst_41 = arith.constant dense<0xFF800000> : vector<16xf32>
    %106 = vector.multi_reduction <maximumf>, %105, %cst_41 [1] : vector<16x16xf32> to vector<16xf32>
    %107 = vector.shape_cast %106 : vector<16xf32> to vector<16x1xf32>
    %108 = vector.broadcast %107 : vector<16x1xf32> to vector<16x16xf32>
    %109 = arith.subf %105, %108 : vector<16x16xf32>
    %110 = math.exp %109 : vector<16x16xf32>
    %cst_42 = arith.constant dense<0.000000e+00> : vector<16xf32>
    %111 = vector.multi_reduction <add>, %110, %cst_42 [1] : vector<16x16xf32> to vector<16xf32>
    %112 = vector.shape_cast %111 : vector<16xf32> to vector<16x1xf32>
    %113 = vector.broadcast %112 : vector<16x1xf32> to vector<16x16xf32>
    %114 = arith.divf %110, %113 : vector<16x16xf32>
    %115 = vector.extract_strided_slice %86 {offsets = [0, 8], sizes = [16, 8], strides = [1, 1]} : vector<16x32xf32> to vector<16x8xf32>
    %cst_43 = arith.constant dense<0.000000e+00> : vector<16x8xf32>
    %116 = tpu.matmul %114, %115, %cst_43 {dimension_numbers = #tpu.dot_dimension_numbers<[1], [0], [0], [1], [0, 0, 1, 1], [], []>} : vector<16x16xf32>, vector<16x8xf32>, vector<16x8xf32> -> vector<16x8xf32>
    %117 = vector.extract_strided_slice %84 {offsets = [0, 16], sizes = [16, 8], strides = [1, 1]} : vector<16x32xf32> to vector<16x8xf32>
    %118 = vector.extract_strided_slice %85 {offsets = [0, 16], sizes = [16, 8], strides = [1, 1]} : vector<16x32xf32> to vector<16x8xf32>
    "tpu.trace_start"() <{level = 10 : i32, message = "qe,ke->qk"}> : () -> ()
    %cst_44 = arith.constant dense<0.000000e+00> : vector<16x16xf32>
    %119 = tpu.matmul %117, %118, %cst_44 {dimension_numbers = #tpu.dot_dimension_numbers<[1], [1], [0], [0], [0, 0, 1, 0], [], []>} : vector<16x8xf32>, vector<16x8xf32>, vector<16x16xf32> -> vector<16x16xf32>
    "tpu.trace_stop"() : () -> ()
    %120 = arith.addf %119, %14 : vector<16x16xf32>
    %cst_45 = arith.constant dense<0xFF800000> : vector<16xf32>
    %121 = vector.multi_reduction <maximumf>, %120, %cst_45 [1] : vector<16x16xf32> to vector<16xf32>
    %122 = vector.shape_cast %121 : vector<16xf32> to vector<16x1xf32>
    %123 = vector.broadcast %122 : vector<16x1xf32> to vector<16x16xf32>
    %124 = arith.subf %120, %123 : vector<16x16xf32>
    %125 = math.exp %124 : vector<16x16xf32>
    %cst_46 = arith.constant dense<0.000000e+00> : vector<16xf32>
    %126 = vector.multi_reduction <add>, %125, %cst_46 [1] : vector<16x16xf32> to vector<16xf32>
    %127 = vector.shape_cast %126 : vector<16xf32> to vector<16x1xf32>
    %128 = vector.broadcast %127 : vector<16x1xf32> to vector<16x16xf32>
    %129 = arith.divf %125, %128 : vector<16x16xf32>
    %130 = vector.extract_strided_slice %86 {offsets = [0, 16], sizes = [16, 8], strides = [1, 1]} : vector<16x32xf32> to vector<16x8xf32>
    %cst_47 = arith.constant dense<0.000000e+00> : vector<16x8xf32>
    %131 = tpu.matmul %129, %130, %cst_47 {dimension_numbers = #tpu.dot_dimension_numbers<[1], [0], [0], [1], [0, 0, 1, 1], [], []>} : vector<16x16xf32>, vector<16x8xf32>, vector<16x8xf32> -> vector<16x8xf32>
    %132 = vector.extract_strided_slice %84 {offsets = [0, 24], sizes = [16, 8], strides = [1, 1]} : vector<16x32xf32> to vector<16x8xf32>
    %133 = vector.extract_strided_slice %85 {offsets = [0, 24], sizes = [16, 8], strides = [1, 1]} : vector<16x32xf32> to vector<16x8xf32>
    "tpu.trace_start"() <{level = 10 : i32, message = "qe,ke->qk"}> : () -> ()
    %cst_48 = arith.constant dense<0.000000e+00> : vector<16x16xf32>
    %134 = tpu.matmul %132, %133, %cst_48 {dimension_numbers = #tpu.dot_dimension_numbers<[1], [1], [0], [0], [0, 0, 1, 0], [], []>} : vector<16x8xf32>, vector<16x8xf32>, vector<16x16xf32> -> vector<16x16xf32>
    "tpu.trace_stop"() : () -> ()
    %135 = arith.addf %134, %14 : vector<16x16xf32>
    %cst_49 = arith.constant dense<0xFF800000> : vector<16xf32>
    %136 = vector.multi_reduction <maximumf>, %135, %cst_49 [1] : vector<16x16xf32> to vector<16xf32>
    %137 = vector.shape_cast %136 : vector<16xf32> to vector<16x1xf32>
    %138 = vector.broadcast %137 : vector<16x1xf32> to vector<16x16xf32>
    %139 = arith.subf %135, %138 : vector<16x16xf32>
    %140 = math.exp %139 : vector<16x16xf32>
    %cst_50 = arith.constant dense<0.000000e+00> : vector<16xf32>
    %141 = vector.multi_reduction <add>, %140, %cst_50 [1] : vector<16x16xf32> to vector<16xf32>
    %142 = vector.shape_cast %141 : vector<16xf32> to vector<16x1xf32>
    %143 = vector.broadcast %142 : vector<16x1xf32> to vector<16x16xf32>
    %144 = arith.divf %140, %143 : vector<16x16xf32>
    %145 = vector.extract_strided_slice %86 {offsets = [0, 24], sizes = [16, 8], strides = [1, 1]} : vector<16x32xf32> to vector<16x8xf32>
    %cst_51 = arith.constant dense<0.000000e+00> : vector<16x8xf32>
    %146 = tpu.matmul %144, %145, %cst_51 {dimension_numbers = #tpu.dot_dimension_numbers<[1], [0], [0], [1], [0, 0, 1, 1], [], []>} : vector<16x16xf32>, vector<16x8xf32>, vector<16x8xf32> -> vector<16x8xf32>
    %147 = tpu.concatenate %101, %116, %131, %146 in 1 : vector<16x8xf32>, vector<16x8xf32>, vector<16x8xf32>, vector<16x8xf32> -> vector<16x32xf32>
    %148 = arith.truncf %147 : vector<16x32xf32> to vector<16x32xbf16>
    %c0_52 = arith.constant 0 : index
    %c0_53 = arith.constant 0 : index
    %c0_54 = arith.constant 0 : index
    %149 = vector.load %arg9[%c0_52, %c0_53, %c0_54] : memref<2x32x32xbf16, #tpu.memory_space<vmem>>, vector<1x32x32xbf16>
    %150 = vector.shape_cast %149 : vector<1x32x32xbf16> to vector<32x32xbf16>
    %cst_55 = arith.constant dense<0.000000e+00> : vector<16x32xf32>
    %151 = tpu.matmul %148, %150, %cst_55 {dimension_numbers = #tpu.dot_dimension_numbers<[1], [0], [0], [1], [0, 0, 1, 1], [], []>} : vector<16x32xbf16>, vector<32x32xbf16>, vector<16x32xf32> -> vector<16x32xf32>
    %c0_56 = arith.constant 0 : index
    %c0_57 = arith.constant 0 : index
    %c0_58 = arith.constant 0 : index
    %152 = vector.load %arg10[%c0_56, %c0_57, %c0_58] : memref<2x1x32xf32, #tpu.memory_space<vmem>>, vector<1x1x32xf32>
    %153 = vector.shape_cast %152 : vector<1x1x32xf32> to vector<1x32xf32>
    %154 = vector.broadcast %153 : vector<1x32xf32> to vector<16x32xf32>
    %155 = arith.addf %151, %154 : vector<16x32xf32>
    %156 = arith.addf %47, %155 : vector<16x32xf32>
    %c0_59 = arith.constant 0 : index
    %c0_60 = arith.constant 0 : index
    %c0_61 = arith.constant 0 : index
    %157 = vector.load %arg11[%c0_59, %c0_60, %c0_61] : memref<2x1x32xf32, #tpu.memory_space<vmem>>, vector<1x1x32xf32>
    %158 = vector.shape_cast %157 : vector<1x1x32xf32> to vector<1x32xf32>
    %c0_62 = arith.constant 0 : index
    %c0_63 = arith.constant 0 : index
    %c0_64 = arith.constant 0 : index
    %159 = vector.load %arg12[%c0_62, %c0_63, %c0_64] : memref<2x1x32xf32, #tpu.memory_space<vmem>>, vector<1x1x32xf32>
    %160 = vector.shape_cast %159 : vector<1x1x32xf32> to vector<1x32xf32>
    %cst_65 = arith.constant dense<0.000000e+00> : vector<16xf32>
    %161 = vector.multi_reduction <add>, %156, %cst_65 [1] : vector<16x32xf32> to vector<16xf32>
    %162 = vector.shape_cast %161 : vector<16xf32> to vector<16x1xf32>
    %cst_66 = arith.constant 3.200000e+01 : f32
    %163 = vector.broadcast %cst_66 : f32 to vector<16x1xf32>
    %164 = arith.divf %162, %163 : vector<16x1xf32>
    %165 = vector.broadcast %164 : vector<16x1xf32> to vector<16x32xf32>
    %166 = arith.subf %156, %165 : vector<16x32xf32>
    %167 = arith.mulf %166, %166 : vector<16x32xf32>
    %cst_67 = arith.constant dense<0.000000e+00> : vector<16xf32>
    %168 = vector.multi_reduction <add>, %167, %cst_67 [1] : vector<16x32xf32> to vector<16xf32>
    %169 = vector.shape_cast %168 : vector<16xf32> to vector<16x1xf32>
    %cst_68 = arith.constant 3.200000e+01 : f32
    %170 = vector.broadcast %cst_68 : f32 to vector<16x1xf32>
    %171 = arith.divf %169, %170 : vector<16x1xf32>
    %172 = vector.broadcast %164 : vector<16x1xf32> to vector<16x32xf32>
    %173 = arith.subf %156, %172 : vector<16x32xf32>
    %cst_69 = arith.constant 9.99999974E-6 : f32
    %174 = vector.broadcast %cst_69 : f32 to vector<16x1xf32>
    %175 = arith.addf %171, %174 : vector<16x1xf32>
    %176 = math.rsqrt %175 : vector<16x1xf32>
    %177 = vector.broadcast %176 : vector<16x1xf32> to vector<16x32xf32>
    %178 = arith.mulf %173, %177 : vector<16x32xf32>
    %179 = vector.broadcast %158 : vector<1x32xf32> to vector<16x32xf32>
    %180 = arith.mulf %178, %179 : vector<16x32xf32>
    %181 = vector.broadcast %160 : vector<1x32xf32> to vector<16x32xf32>
    %182 = arith.addf %180, %181 : vector<16x32xf32>
    %183 = arith.truncf %182 : vector<16x32xf32> to vector<16x32xbf16>
    %c0_70 = arith.constant 0 : index
    %c0_71 = arith.constant 0 : index
    %c0_72 = arith.constant 0 : index
    %184 = vector.load %arg13[%c0_70, %c0_71, %c0_72] : memref<2x32x64xbf16, #tpu.memory_space<vmem>>, vector<1x32x64xbf16>
    %185 = vector.shape_cast %184 : vector<1x32x64xbf16> to vector<32x64xbf16>
    %cst_73 = arith.constant dense<0.000000e+00> : vector<16x64xf32>
    %186 = tpu.matmul %183, %185, %cst_73 {dimension_numbers = #tpu.dot_dimension_numbers<[1], [0], [0], [1], [0, 0, 1, 1], [], []>} : vector<16x32xbf16>, vector<32x64xbf16>, vector<16x64xf32> -> vector<16x64xf32>
    %c0_74 = arith.constant 0 : index
    %c0_75 = arith.constant 0 : index
    %c0_76 = arith.constant 0 : index
    %187 = vector.load %arg14[%c0_74, %c0_75, %c0_76] : memref<2x1x64xf32, #tpu.memory_space<vmem>>, vector<1x1x64xf32>
    %188 = vector.shape_cast %187 : vector<1x1x64xf32> to vector<1x64xf32>
    %189 = vector.broadcast %188 : vector<1x64xf32> to vector<16x64xf32>
    %190 = arith.addf %186, %189 : vector<16x64xf32>
    %cst_77 = arith.constant 1.702000e+00 : f32
    %191 = vector.broadcast %cst_77 : f32 to vector<16x64xf32>
    %192 = arith.mulf %191, %190 : vector<16x64xf32>
    %193 = arith.negf %192 : vector<16x64xf32>
    %194 = math.exp %193 : vector<16x64xf32>
    %cst_78 = arith.constant 1.000000e+00 : f32
    %195 = vector.broadcast %cst_78 : f32 to vector<16x64xf32>
    %196 = arith.addf %195, %194 : vector<16x64xf32>
    %197 = arith.divf %195, %196 : vector<16x64xf32>
    %198 = arith.mulf %190, %197 : vector<16x64xf32>
    %199 = arith.truncf %198 : vector<16x64xf32> to vector<16x64xbf16>
    %c0_79 = arith.constant 0 : index
    %c0_80 = arith.constant 0 : index
    %c0_81 = arith.constant 0 : index
    %200 = vector.load %arg15[%c0_79, %c0_80, %c0_81] : memref<2x64x32xbf16, #tpu.memory_space<vmem>>, vector<1x64x32xbf16>
    %201 = vector.shape_cast %200 : vector<1x64x32xbf16> to vector<64x32xbf16>
    %cst_82 = arith.constant dense<0.000000e+00> : vector<16x32xf32>
    %202 = tpu.matmul %199, %201, %cst_82 {dimension_numbers = #tpu.dot_dimension_numbers<[1], [0], [0], [1], [0, 0, 1, 1], [], []>} : vector<16x64xbf16>, vector<64x32xbf16>, vector<16x32xf32> -> vector<16x32xf32>
    %c0_83 = arith.constant 0 : index
    %c0_84 = arith.constant 0 : index
    %c0_85 = arith.constant 0 : index
    %203 = vector.load %arg16[%c0_83, %c0_84, %c0_85] : memref<2x1x32xf32, #tpu.memory_space<vmem>>, vector<1x1x32xf32>
    %204 = vector.shape_cast %203 : vector<1x1x32xf32> to vector<1x32xf32>
    %205 = vector.broadcast %204 : vector<1x32xf32> to vector<16x32xf32>
    %206 = arith.addf %202, %205 : vector<16x32xf32>
    %207 = arith.addf %156, %206 : vector<16x32xf32>
    %c1 = arith.constant 1 : index
    %c0_86 = arith.constant 0 : index
    %c0_87 = arith.constant 0 : index
    %208 = vector.load %arg5[%c1, %c0_86, %c0_87] : memref<2x1x32xf32, #tpu.memory_space<vmem>>, vector<1x1x32xf32>
    %209 = vector.shape_cast %208 : vector<1x1x32xf32> to vector<1x32xf32>
    %c1_88 = arith.constant 1 : index
    %c0_89 = arith.constant 0 : index
    %c0_90 = arith.constant 0 : index
    %210 = vector.load %arg6[%c1_88, %c0_89, %c0_90] : memref<2x1x32xf32, #tpu.memory_space<vmem>>, vector<1x1x32xf32>
    %211 = vector.shape_cast %210 : vector<1x1x32xf32> to vector<1x32xf32>
    %cst_91 = arith.constant dense<0.000000e+00> : vector<16xf32>
    %212 = vector.multi_reduction <add>, %207, %cst_91 [1] : vector<16x32xf32> to vector<16xf32>
    %213 = vector.shape_cast %212 : vector<16xf32> to vector<16x1xf32>
    %cst_92 = arith.constant 3.200000e+01 : f32
    %214 = vector.broadcast %cst_92 : f32 to vector<16x1xf32>
    %215 = arith.divf %213, %214 : vector<16x1xf32>
    %216 = vector.broadcast %215 : vector<16x1xf32> to vector<16x32xf32>
    %217 = arith.subf %207, %216 : vector<16x32xf32>
    %218 = arith.mulf %217, %217 : vector<16x32xf32>
    %cst_93 = arith.constant dense<0.000000e+00> : vector<16xf32>
    %219 = vector.multi_reduction <add>, %218, %cst_93 [1] : vector<16x32xf32> to vector<16xf32>
    %220 = vector.shape_cast %219 : vector<16xf32> to vector<16x1xf32>
    %cst_94 = arith.constant 3.200000e+01 : f32
    %221 = vector.broadcast %cst_94 : f32 to vector<16x1xf32>
    %222 = arith.divf %220, %221 : vector<16x1xf32>
    %223 = vector.broadcast %215 : vector<16x1xf32> to vector<16x32xf32>
    %224 = arith.subf %207, %223 : vector<16x32xf32>
    %cst_95 = arith.constant 9.99999974E-6 : f32
    %225 = vector.broadcast %cst_95 : f32 to vector<16x1xf32>
    %226 = arith.addf %222, %225 : vector<16x1xf32>
    %227 = math.rsqrt %226 : vector<16x1xf32>
    %228 = vector.broadcast %227 : vector<16x1xf32> to vector<16x32xf32>
    %229 = arith.mulf %224, %228 : vector<16x32xf32>
    %230 = vector.broadcast %209 : vector<1x32xf32> to vector<16x32xf32>
    %231 = arith.mulf %229, %230 : vector<16x32xf32>
    %232 = vector.broadcast %211 : vector<1x32xf32> to vector<16x32xf32>
    %233 = arith.addf %231, %232 : vector<16x32xf32>
    %234 = arith.truncf %233 : vector<16x32xf32> to vector<16x32xbf16>
    %c1_96 = arith.constant 1 : index
    %c0_97 = arith.constant 0 : index
    %c0_98 = arith.constant 0 : index
    %235 = vector.load %arg7[%c1_96, %c0_97, %c0_98] : memref<2x32x96xbf16, #tpu.memory_space<vmem>>, vector<1x32x96xbf16>
    %236 = vector.shape_cast %235 : vector<1x32x96xbf16> to vector<32x96xbf16>
    %cst_99 = arith.constant dense<0.000000e+00> : vector<16x96xf32>
    %237 = tpu.matmul %234, %236, %cst_99 {dimension_numbers = #tpu.dot_dimension_numbers<[1], [0], [0], [1], [0, 0, 1, 1], [], []>} : vector<16x32xbf16>, vector<32x96xbf16>, vector<16x96xf32> -> vector<16x96xf32>
    %c1_100 = arith.constant 1 : index
    %c0_101 = arith.constant 0 : index
    %c0_102 = arith.constant 0 : index
    %238 = vector.load %arg8[%c1_100, %c0_101, %c0_102] : memref<2x1x96xf32, #tpu.memory_space<vmem>>, vector<1x1x96xf32>
    %239 = vector.shape_cast %238 : vector<1x1x96xf32> to vector<1x96xf32>
    %240 = vector.broadcast %239 : vector<1x96xf32> to vector<16x96xf32>
    %241 = arith.addf %237, %240 : vector<16x96xf32>
    %242 = vector.extract_strided_slice %241 {offsets = [0, 0], sizes = [16, 32], strides = [1, 1]} : vector<16x96xf32> to vector<16x32xf32>
    %cst_103 = arith.constant 0.353553385 : f32
    %243 = vector.broadcast %cst_103 : f32 to vector<16x32xf32>
    %244 = arith.mulf %242, %243 : vector<16x32xf32>
    %245 = vector.extract_strided_slice %241 {offsets = [0, 32], sizes = [16, 32], strides = [1, 1]} : vector<16x96xf32> to vector<16x32xf32>
    %246 = vector.extract_strided_slice %241 {offsets = [0, 64], sizes = [16, 32], strides = [1, 1]} : vector<16x96xf32> to vector<16x32xf32>
    %247 = vector.extract_strided_slice %244 {offsets = [0, 0], sizes = [16, 8], strides = [1, 1]} : vector<16x32xf32> to vector<16x8xf32>
    %248 = vector.extract_strided_slice %245 {offsets = [0, 0], sizes = [16, 8], strides = [1, 1]} : vector<16x32xf32> to vector<16x8xf32>
    "tpu.trace_start"() <{level = 10 : i32, message = "qe,ke->qk"}> : () -> ()
    %cst_104 = arith.constant dense<0.000000e+00> : vector<16x16xf32>
    %249 = tpu.matmul %247, %248, %cst_104 {dimension_numbers = #tpu.dot_dimension_numbers<[1], [1], [0], [0], [0, 0, 1, 0], [], []>} : vector<16x8xf32>, vector<16x8xf32>, vector<16x16xf32> -> vector<16x16xf32>
    "tpu.trace_stop"() : () -> ()
    %250 = arith.addf %249, %14 : vector<16x16xf32>
    %cst_105 = arith.constant dense<0xFF800000> : vector<16xf32>
    %251 = vector.multi_reduction <maximumf>, %250, %cst_105 [1] : vector<16x16xf32> to vector<16xf32>
    %252 = vector.shape_cast %251 : vector<16xf32> to vector<16x1xf32>
    %253 = vector.broadcast %252 : vector<16x1xf32> to vector<16x16xf32>
    %254 = arith.subf %250, %253 : vector<16x16xf32>
    %255 = math.exp %254 : vector<16x16xf32>
    %cst_106 = arith.constant dense<0.000000e+00> : vector<16xf32>
    %256 = vector.multi_reduction <add>, %255, %cst_106 [1] : vector<16x16xf32> to vector<16xf32>
    %257 = vector.shape_cast %256 : vector<16xf32> to vector<16x1xf32>
    %258 = vector.broadcast %257 : vector<16x1xf32> to vector<16x16xf32>
    %259 = arith.divf %255, %258 : vector<16x16xf32>
    %260 = vector.extract_strided_slice %246 {offsets = [0, 0], sizes = [16, 8], strides = [1, 1]} : vector<16x32xf32> to vector<16x8xf32>
    %cst_107 = arith.constant dense<0.000000e+00> : vector<16x8xf32>
    %261 = tpu.matmul %259, %260, %cst_107 {dimension_numbers = #tpu.dot_dimension_numbers<[1], [0], [0], [1], [0, 0, 1, 1], [], []>} : vector<16x16xf32>, vector<16x8xf32>, vector<16x8xf32> -> vector<16x8xf32>
    %262 = vector.extract_strided_slice %244 {offsets = [0, 8], sizes = [16, 8], strides = [1, 1]} : vector<16x32xf32> to vector<16x8xf32>
    %263 = vector.extract_strided_slice %245 {offsets = [0, 8], sizes = [16, 8], strides = [1, 1]} : vector<16x32xf32> to vector<16x8xf32>
    "tpu.trace_start"() <{level = 10 : i32, message = "qe,ke->qk"}> : () -> ()
    %cst_108 = arith.constant dense<0.000000e+00> : vector<16x16xf32>
    %264 = tpu.matmul %262, %263, %cst_108 {dimension_numbers = #tpu.dot_dimension_numbers<[1], [1], [0], [0], [0, 0, 1, 0], [], []>} : vector<16x8xf32>, vector<16x8xf32>, vector<16x16xf32> -> vector<16x16xf32>
    "tpu.trace_stop"() : () -> ()
    %265 = arith.addf %264, %14 : vector<16x16xf32>
    %cst_109 = arith.constant dense<0xFF800000> : vector<16xf32>
    %266 = vector.multi_reduction <maximumf>, %265, %cst_109 [1] : vector<16x16xf32> to vector<16xf32>
    %267 = vector.shape_cast %266 : vector<16xf32> to vector<16x1xf32>
    %268 = vector.broadcast %267 : vector<16x1xf32> to vector<16x16xf32>
    %269 = arith.subf %265, %268 : vector<16x16xf32>
    %270 = math.exp %269 : vector<16x16xf32>
    %cst_110 = arith.constant dense<0.000000e+00> : vector<16xf32>
    %271 = vector.multi_reduction <add>, %270, %cst_110 [1] : vector<16x16xf32> to vector<16xf32>
    %272 = vector.shape_cast %271 : vector<16xf32> to vector<16x1xf32>
    %273 = vector.broadcast %272 : vector<16x1xf32> to vector<16x16xf32>
    %274 = arith.divf %270, %273 : vector<16x16xf32>
    %275 = vector.extract_strided_slice %246 {offsets = [0, 8], sizes = [16, 8], strides = [1, 1]} : vector<16x32xf32> to vector<16x8xf32>
    %cst_111 = arith.constant dense<0.000000e+00> : vector<16x8xf32>
    %276 = tpu.matmul %274, %275, %cst_111 {dimension_numbers = #tpu.dot_dimension_numbers<[1], [0], [0], [1], [0, 0, 1, 1], [], []>} : vector<16x16xf32>, vector<16x8xf32>, vector<16x8xf32> -> vector<16x8xf32>
    %277 = vector.extract_strided_slice %244 {offsets = [0, 16], sizes = [16, 8], strides = [1, 1]} : vector<16x32xf32> to vector<16x8xf32>
    %278 = vector.extract_strided_slice %245 {offsets = [0, 16], sizes = [16, 8], strides = [1, 1]} : vector<16x32xf32> to vector<16x8xf32>
    "tpu.trace_start"() <{level = 10 : i32, message = "qe,ke->qk"}> : () -> ()
    %cst_112 = arith.constant dense<0.000000e+00> : vector<16x16xf32>
    %279 = tpu.matmul %277, %278, %cst_112 {dimension_numbers = #tpu.dot_dimension_numbers<[1], [1], [0], [0], [0, 0, 1, 0], [], []>} : vector<16x8xf32>, vector<16x8xf32>, vector<16x16xf32> -> vector<16x16xf32>
    "tpu.trace_stop"() : () -> ()
    %280 = arith.addf %279, %14 : vector<16x16xf32>
    %cst_113 = arith.constant dense<0xFF800000> : vector<16xf32>
    %281 = vector.multi_reduction <maximumf>, %280, %cst_113 [1] : vector<16x16xf32> to vector<16xf32>
    %282 = vector.shape_cast %281 : vector<16xf32> to vector<16x1xf32>
    %283 = vector.broadcast %282 : vector<16x1xf32> to vector<16x16xf32>
    %284 = arith.subf %280, %283 : vector<16x16xf32>
    %285 = math.exp %284 : vector<16x16xf32>
    %cst_114 = arith.constant dense<0.000000e+00> : vector<16xf32>
    %286 = vector.multi_reduction <add>, %285, %cst_114 [1] : vector<16x16xf32> to vector<16xf32>
    %287 = vector.shape_cast %286 : vector<16xf32> to vector<16x1xf32>
    %288 = vector.broadcast %287 : vector<16x1xf32> to vector<16x16xf32>
    %289 = arith.divf %285, %288 : vector<16x16xf32>
    %290 = vector.extract_strided_slice %246 {offsets = [0, 16], sizes = [16, 8], strides = [1, 1]} : vector<16x32xf32> to vector<16x8xf32>
    %cst_115 = arith.constant dense<0.000000e+00> : vector<16x8xf32>
    %291 = tpu.matmul %289, %290, %cst_115 {dimension_numbers = #tpu.dot_dimension_numbers<[1], [0], [0], [1], [0, 0, 1, 1], [], []>} : vector<16x16xf32>, vector<16x8xf32>, vector<16x8xf32> -> vector<16x8xf32>
    %292 = vector.extract_strided_slice %244 {offsets = [0, 24], sizes = [16, 8], strides = [1, 1]} : vector<16x32xf32> to vector<16x8xf32>
    %293 = vector.extract_strided_slice %245 {offsets = [0, 24], sizes = [16, 8], strides = [1, 1]} : vector<16x32xf32> to vector<16x8xf32>
    "tpu.trace_start"() <{level = 10 : i32, message = "qe,ke->qk"}> : () -> ()
    %cst_116 = arith.constant dense<0.000000e+00> : vector<16x16xf32>
    %294 = tpu.matmul %292, %293, %cst_116 {dimension_numbers = #tpu.dot_dimension_numbers<[1], [1], [0], [0], [0, 0, 1, 0], [], []>} : vector<16x8xf32>, vector<16x8xf32>, vector<16x16xf32> -> vector<16x16xf32>
    "tpu.trace_stop"() : () -> ()
    %295 = arith.addf %294, %14 : vector<16x16xf32>
    %cst_117 = arith.constant dense<0xFF800000> : vector<16xf32>
    %296 = vector.multi_reduction <maximumf>, %295, %cst_117 [1] : vector<16x16xf32> to vector<16xf32>
    %297 = vector.shape_cast %296 : vector<16xf32> to vector<16x1xf32>
    %298 = vector.broadcast %297 : vector<16x1xf32> to vector<16x16xf32>
    %299 = arith.subf %295, %298 : vector<16x16xf32>
    %300 = math.exp %299 : vector<16x16xf32>
    %cst_118 = arith.constant dense<0.000000e+00> : vector<16xf32>
    %301 = vector.multi_reduction <add>, %300, %cst_118 [1] : vector<16x16xf32> to vector<16xf32>
    %302 = vector.shape_cast %301 : vector<16xf32> to vector<16x1xf32>
    %303 = vector.broadcast %302 : vector<16x1xf32> to vector<16x16xf32>
    %304 = arith.divf %300, %303 : vector<16x16xf32>
    %305 = vector.extract_strided_slice %246 {offsets = [0, 24], sizes = [16, 8], strides = [1, 1]} : vector<16x32xf32> to vector<16x8xf32>
    %cst_119 = arith.constant dense<0.000000e+00> : vector<16x8xf32>
    %306 = tpu.matmul %304, %305, %cst_119 {dimension_numbers = #tpu.dot_dimension_numbers<[1], [0], [0], [1], [0, 0, 1, 1], [], []>} : vector<16x16xf32>, vector<16x8xf32>, vector<16x8xf32> -> vector<16x8xf32>
    %307 = tpu.concatenate %261, %276, %291, %306 in 1 : vector<16x8xf32>, vector<16x8xf32>, vector<16x8xf32>, vector<16x8xf32> -> vector<16x32xf32>
    %308 = arith.truncf %307 : vector<16x32xf32> to vector<16x32xbf16>
    %c1_120 = arith.constant 1 : index
    %c0_121 = arith.constant 0 : index
    %c0_122 = arith.constant 0 : index
    %309 = vector.load %arg9[%c1_120, %c0_121, %c0_122] : memref<2x32x32xbf16, #tpu.memory_space<vmem>>, vector<1x32x32xbf16>
    %310 = vector.shape_cast %309 : vector<1x32x32xbf16> to vector<32x32xbf16>
    %cst_123 = arith.constant dense<0.000000e+00> : vector<16x32xf32>
    %311 = tpu.matmul %308, %310, %cst_123 {dimension_numbers = #tpu.dot_dimension_numbers<[1], [0], [0], [1], [0, 0, 1, 1], [], []>} : vector<16x32xbf16>, vector<32x32xbf16>, vector<16x32xf32> -> vector<16x32xf32>
    %c1_124 = arith.constant 1 : index
    %c0_125 = arith.constant 0 : index
    %c0_126 = arith.constant 0 : index
    %312 = vector.load %arg10[%c1_124, %c0_125, %c0_126] : memref<2x1x32xf32, #tpu.memory_space<vmem>>, vector<1x1x32xf32>
    %313 = vector.shape_cast %312 : vector<1x1x32xf32> to vector<1x32xf32>
    %314 = vector.broadcast %313 : vector<1x32xf32> to vector<16x32xf32>
    %315 = arith.addf %311, %314 : vector<16x32xf32>
    %316 = arith.addf %207, %315 : vector<16x32xf32>
    %c1_127 = arith.constant 1 : index
    %c0_128 = arith.constant 0 : index
    %c0_129 = arith.constant 0 : index
    %317 = vector.load %arg11[%c1_127, %c0_128, %c0_129] : memref<2x1x32xf32, #tpu.memory_space<vmem>>, vector<1x1x32xf32>
    %318 = vector.shape_cast %317 : vector<1x1x32xf32> to vector<1x32xf32>
    %c1_130 = arith.constant 1 : index
    %c0_131 = arith.constant 0 : index
    %c0_132 = arith.constant 0 : index
    %319 = vector.load %arg12[%c1_130, %c0_131, %c0_132] : memref<2x1x32xf32, #tpu.memory_space<vmem>>, vector<1x1x32xf32>
    %320 = vector.shape_cast %319 : vector<1x1x32xf32> to vector<1x32xf32>
    %cst_133 = arith.constant dense<0.000000e+00> : vector<16xf32>
    %321 = vector.multi_reduction <add>, %316, %cst_133 [1] : vector<16x32xf32> to vector<16xf32>
    %322 = vector.shape_cast %321 : vector<16xf32> to vector<16x1xf32>
    %cst_134 = arith.constant 3.200000e+01 : f32
    %323 = vector.broadcast %cst_134 : f32 to vector<16x1xf32>
    %324 = arith.divf %322, %323 : vector<16x1xf32>
    %325 = vector.broadcast %324 : vector<16x1xf32> to vector<16x32xf32>
    %326 = arith.subf %316, %325 : vector<16x32xf32>
    %327 = arith.mulf %326, %326 : vector<16x32xf32>
    %cst_135 = arith.constant dense<0.000000e+00> : vector<16xf32>
    %328 = vector.multi_reduction <add>, %327, %cst_135 [1] : vector<16x32xf32> to vector<16xf32>
    %329 = vector.shape_cast %328 : vector<16xf32> to vector<16x1xf32>
    %cst_136 = arith.constant 3.200000e+01 : f32
    %330 = vector.broadcast %cst_136 : f32 to vector<16x1xf32>
    %331 = arith.divf %329, %330 : vector<16x1xf32>
    %332 = vector.broadcast %324 : vector<16x1xf32> to vector<16x32xf32>
    %333 = arith.subf %316, %332 : vector<16x32xf32>
    %cst_137 = arith.constant 9.99999974E-6 : f32
    %334 = vector.broadcast %cst_137 : f32 to vector<16x1xf32>
    %335 = arith.addf %331, %334 : vector<16x1xf32>
    %336 = math.rsqrt %335 : vector<16x1xf32>
    %337 = vector.broadcast %336 : vector<16x1xf32> to vector<16x32xf32>
    %338 = arith.mulf %333, %337 : vector<16x32xf32>
    %339 = vector.broadcast %318 : vector<1x32xf32> to vector<16x32xf32>
    %340 = arith.mulf %338, %339 : vector<16x32xf32>
    %341 = vector.broadcast %320 : vector<1x32xf32> to vector<16x32xf32>
    %342 = arith.addf %340, %341 : vector<16x32xf32>
    %343 = arith.truncf %342 : vector<16x32xf32> to vector<16x32xbf16>
    %c1_138 = arith.constant 1 : index
    %c0_139 = arith.constant 0 : index
    %c0_140 = arith.constant 0 : index
    %344 = vector.load %arg13[%c1_138, %c0_139, %c0_140] : memref<2x32x64xbf16, #tpu.memory_space<vmem>>, vector<1x32x64xbf16>
    %345 = vector.shape_cast %344 : vector<1x32x64xbf16> to vector<32x64xbf16>
    %cst_141 = arith.constant dense<0.000000e+00> : vector<16x64xf32>
    %346 = tpu.matmul %343, %345, %cst_141 {dimension_numbers = #tpu.dot_dimension_numbers<[1], [0], [0], [1], [0, 0, 1, 1], [], []>} : vector<16x32xbf16>, vector<32x64xbf16>, vector<16x64xf32> -> vector<16x64xf32>
    %c1_142 = arith.constant 1 : index
    %c0_143 = arith.constant 0 : index
    %c0_144 = arith.constant 0 : index
    %347 = vector.load %arg14[%c1_142, %c0_143, %c0_144] : memref<2x1x64xf32, #tpu.memory_space<vmem>>, vector<1x1x64xf32>
    %348 = vector.shape_cast %347 : vector<1x1x64xf32> to vector<1x64xf32>
    %349 = vector.broadcast %348 : vector<1x64xf32> to vector<16x64xf32>
    %350 = arith.addf %346, %349 : vector<16x64xf32>
    %cst_145 = arith.constant 1.702000e+00 : f32
    %351 = vector.broadcast %cst_145 : f32 to vector<16x64xf32>
    %352 = arith.mulf %351, %350 : vector<16x64xf32>
    %353 = arith.negf %352 : vector<16x64xf32>
    %354 = math.exp %353 : vector<16x64xf32>
    %cst_146 = arith.constant 1.000000e+00 : f32
    %355 = vector.broadcast %cst_146 : f32 to vector<16x64xf32>
    %356 = arith.addf %355, %354 : vector<16x64xf32>
    %357 = arith.divf %355, %356 : vector<16x64xf32>
    %358 = arith.mulf %350, %357 : vector<16x64xf32>
    %359 = arith.truncf %358 : vector<16x64xf32> to vector<16x64xbf16>
    %c1_147 = arith.constant 1 : index
    %c0_148 = arith.constant 0 : index
    %c0_149 = arith.constant 0 : index
    %360 = vector.load %arg15[%c1_147, %c0_148, %c0_149] : memref<2x64x32xbf16, #tpu.memory_space<vmem>>, vector<1x64x32xbf16>
    %361 = vector.shape_cast %360 : vector<1x64x32xbf16> to vector<64x32xbf16>
    %cst_150 = arith.constant dense<0.000000e+00> : vector<16x32xf32>
    %362 = tpu.matmul %359, %361, %cst_150 {dimension_numbers = #tpu.dot_dimension_numbers<[1], [0], [0], [1], [0, 0, 1, 1], [], []>} : vector<16x64xbf16>, vector<64x32xbf16>, vector<16x32xf32> -> vector<16x32xf32>
    %c1_151 = arith.constant 1 : index
    %c0_152 = arith.constant 0 : index
    %c0_153 = arith.constant 0 : index
    %363 = vector.load %arg16[%c1_151, %c0_152, %c0_153] : memref<2x1x32xf32, #tpu.memory_space<vmem>>, vector<1x1x32xf32>
    %364 = vector.shape_cast %363 : vector<1x1x32xf32> to vector<1x32xf32>
    %365 = vector.broadcast %364 : vector<1x32xf32> to vector<16x32xf32>
    %366 = arith.addf %362, %365 : vector<16x32xf32>
    %367 = arith.addf %316, %366 : vector<16x32xf32>
    %c0_154 = arith.constant 0 : index
    %c0_155 = arith.constant 0 : index
    %368 = vector.load %arg19[%c0_154, %c0_155] : memref<16x32xf32, #tpu.memory_space<vmem>>, vector<16x32xf32>
    tpu.vector_store %arg19[%c0_154, %c0_155], %367 {strides = array<i32>} : memref<16x32xf32, #tpu.memory_space<vmem>>, vector<16x32xf32>,
    %369 = vector.shape_cast %367 : vector<16x32xf32> to vector<2x8x32xf32>
    %370 = vector.extract_strided_slice %369 {offsets = [0, 0, 0], sizes = [2, 1, 32], strides = [1, 1, 1]} : vector<2x8x32xf32> to vector<2x1x32xf32>
    %371 = vector.shape_cast %370 : vector<2x1x32xf32> to vector<2x32xf32>
    %c0_156 = arith.constant 0 : index
    %c0_157 = arith.constant 0 : index
    %372 = vector.load %arg17[%c0_156, %c0_157] : memref<1x32xf32, #tpu.memory_space<vmem>>, vector<1x32xf32>
    %c0_158 = arith.constant 0 : index
    %c0_159 = arith.constant 0 : index
    %373 = vector.load %arg18[%c0_158, %c0_159] : memref<1x32xf32, #tpu.memory_space<vmem>>, vector<1x32xf32>
    %cst_160 = arith.constant dense<0.000000e+00> : vector<2xf32>
    %374 = vector.multi_reduction <add>, %371, %cst_160 [1] : vector<2x32xf32> to vector<2xf32>
    %375 = vector.shape_cast %374 : vector<2xf32> to vector<2x1xf32>
    %cst_161 = arith.constant 3.200000e+01 : f32
    %376 = vector.broadcast %cst_161 : f32 to vector<2x1xf32>
    %377 = arith.divf %375, %376 : vector<2x1xf32>
    %378 = vector.broadcast %377 : vector<2x1xf32> to vector<2x32xf32>
    %379 = arith.subf %371, %378 : vector<2x32xf32>
    %380 = arith.mulf %379, %379 : vector<2x32xf32>
    %cst_162 = arith.constant dense<0.000000e+00> : vector<2xf32>
    %381 = vector.multi_reduction <add>, %380, %cst_162 [1] : vector<2x32xf32> to vector<2xf32>
    %382 = vector.shape_cast %381 : vector<2xf32> to vector<2x1xf32>
    %cst_163 = arith.constant 3.200000e+01 : f32
    %383 = vector.broadcast %cst_163 : f32 to vector<2x1xf32>
    %384 = arith.divf %382, %383 : vector<2x1xf32>
    %385 = vector.broadcast %377 : vector<2x1xf32> to vector<2x32xf32>
    %386 = arith.subf %371, %385 : vector<2x32xf32>
    %cst_164 = arith.constant 9.99999974E-6 : f32
    %387 = vector.broadcast %cst_164 : f32 to vector<2x1xf32>
    %388 = arith.addf %384, %387 : vector<2x1xf32>
    %389 = math.rsqrt %388 : vector<2x1xf32>
    %390 = vector.broadcast %389 : vector<2x1xf32> to vector<2x32xf32>
    %391 = arith.mulf %386, %390 : vector<2x32xf32>
    %392 = vector.broadcast %372 : vector<1x32xf32> to vector<2x32xf32>
    %393 = arith.mulf %391, %392 : vector<2x32xf32>
    %394 = vector.broadcast %373 : vector<1x32xf32> to vector<2x32xf32>
    %395 = arith.addf %393, %394 : vector<2x32xf32>
    %c0_165 = arith.constant 0 : index
    %c0_166 = arith.constant 0 : index
    %396 = vector.load %arg20[%c0_165, %c0_166] : memref<2x32xf32, #tpu.memory_space<vmem>>, vector<2x32xf32>
    tpu.vector_store %arg20[%c0_165, %c0_166], %395 {strides = array<i32>} : memref<2x32xf32, #tpu.memory_space<vmem>>, vector<2x32xf32>,
    return
  }
}

</mosaic_0001>

<bundles_post_ra>
// kernel: clip_encoder_forward.1
= control target key start
LH: loop header
LB: loop body
LE: loop exit
PB: predicated region body
PF: predicated region fallthrough
CT: control target
= control target key end

     0   :  { %s4326_s0 = inlined_call_operand.vmem [shape: bf16[16,192], index: 0, kind: input, shape index: {}]   ;;  %s4327_s1 = inlined_call_operand.vmem [shape: f32[8,32], index: 1, kind: input, shape index: {}]   ;;  %s4328_s2 = inlined_call_operand.vmem [shape: bf16[192,32], index: 2, kind: input, shape index: {}]   ;;  %s4329_s3 = inlined_call_operand.vmem [shape: f32[1,32], index: 3, kind: input, shape index: {}]   ;;  %s4330_s4 = inlined_call_operand.vmem [shape: f32[1,32], index: 4, kind: input, shape index: {}]   ;;  %s4331_s5 = inlined_call_operand.vmem [shape: f32[2,1,32], index: 5, kind: input, shape index: {}]   ;;  %s4332_s6 = inlined_call_operand.vmem [shape: f32[2,1,32], index: 6, kind: input, shape index: {}]   ;;  %s4333_s7 = inlined_call_operand.vmem [shape: bf16[2,32,96], index: 7, kind: input, shape index: {}]   ;;  %s4334_s8 = inlined_call_operand.vmem [shape: f32[2,1,96], index: 8, kind: input, shape index: {}]   ;;  %s4335_s9 = inlined_call_operand.vmem [shape: bf16[2,32,32], index: 9, kind: input, shape index: {}]   ;;  %s4336_s10 = inlined_call_operand.vmem [shape: f32[2,1,32], index: 10, kind: input, shape index: {}]   ;;  %s4337_s11 = inlined_call_operand.vmem [shape: f32[2,1,32], index: 11, kind: input, shape index: {}]   ;;  %s4338_s12 = inlined_call_operand.vmem [shape: f32[2,1,32], index: 12, kind: input, shape index: {}]   ;;  %s4339_s13 = inlined_call_operand.vmem [shape: bf16[2,32,64], index: 13, kind: input, shape index: {}]   ;;  %s4340_s14 = inlined_call_operand.vmem [shape: f32[2,1,64], index: 14, kind: input, shape index: {}]   ;;  %s4341_s15 = inlined_call_operand.vmem [shape: bf16[2,64,32], index: 15, kind: input, shape index: {}]   ;;  %s4342_s16 = inlined_call_operand.vmem [shape: f32[2,1,32], index: 16, kind: input, shape index: {}]   ;;  %s4343_s17 = inlined_call_operand.vmem [shape: f32[1,32], index: 17, kind: input, shape index: {}]   ;;  %s4344_s18 = inlined_call_operand.vmem [shape: f32[1,32], index: 18, kind: input, shape index: {}]   ;;  %s4345_s19 = inlined_call_operand.hbm [shape: f32[16,32], index: 19, kind: output, shape index: {0}]   ;;  %s4346_s20 = inlined_call_operand.hbm [shape: f32[2,32], index: 20, kind: output, shape index: {1}]  }
   0x1   :  { %4358 = sst [smem:[#allocation8_spill]] %s4326_s0 }
   0x2   :  { %4359 = sst [smem:[#allocation9_spill]] %s4327_s1 }
   0x3   :  { %4360 = sst [smem:[#allocation10_spill]] %s4328_s2 }
   0x4   :  { %4361 = sst [smem:[#allocation11_spill]] %s4329_s3 }
   0x5   :  { %4362 = sst [smem:[#allocation12_spill]] %s4330_s4 }
   0x6   :  { %26 = vsyncpa [#allocation3], 0  ;;  %s4363_s23 = sld [smem:[#allocation10_spill]]  ;;  %v3660_v1 = vmov 0   ;;  %vm191_vm0 = vcmask 523264   ;;  %s4364_s0 = sld [smem:[#allocation8_spill]] }
   0x7   :  { %195 = vmatprep.subr.bf16.mxu0 %v3660_v1 }
   0xc   :  { %v3475_v0 = vld [vmem:[%s4363_s23] sm:$0xff]   ;;  %v3476_v2 = vld [vmem:[%s4363_s23 + $0x8] sm:$0xff]   ;;  %v3477_v3 = vld [vmem:[%s4363_s23 + $0x10] sm:$0xff]  }
   0xd   :  { %196 = vmatpush1.bf16.msra.mxu0 %v3475_v0  ;;  %v3478_v4 = vld [vmem:[%s4363_s23 + $0x18] sm:$0xff]   ;;  %v3479_v5 = vld [vmem:[%s4363_s23 + $0x20] sm:$0xff]   ;;  %v3480_v7 = vld [vmem:[%s4363_s23 + $0x28] sm:$0xff]  }
   0xe   :  { %197 = vmatprep.subr.bf16.mxu0 %v3660_v1  ;;  %v3489_v6 = vld [vmem:[%s4364_s0 + $0x4] ss:$8 sps:$4 sm:$0xff]   ;;  %v3481_v8 = vld [vmem:[%s4363_s23 + $0x30] sm:$0xff]   ;;  %v3482_v9 = vld [vmem:[%s4363_s23 + $0x38] sm:$0xff]  }
   0xf   :  { %2859 = vmatprep.mubr.msk.bf16.mxu0 %vm191_vm0, %v3489_v6 }
  0x11   :  { %198 = vmatpush1.bf16.msra.mxu0 %v3476_v2 }
  0x12   :  { %199 = vmatprep.subr.bf16.mxu0 %v3660_v1 }
  0x15   :  { %200 = vmatpush1.bf16.msra.mxu0 %v3477_v3 }
  0x16   :  { %201 = vmatprep.subr.bf16.mxu0 %v3660_v1 }
  0x19   :  { %202 = vmatpush1.bf16.msra.mxu0 %v3478_v4 }
  0x1a   :  { %203 = vmatprep.subr.bf16.mxu0 %v3660_v1 }
  0x1d   :  { %204 = vmatpush1.bf16.msra.mxu0 %v3479_v5 }
  0x1e   :  { %205 = vmatprep.subr.bf16.mxu0 %v3660_v1 }
  0x21   :  { %206 = vmatpush1.bf16.msra.mxu0 %v3480_v7 }
  0x22   :  { %207 = vmatprep.subr.bf16.mxu0 %v3660_v1 }
  0x25   :  { %208 = vmatpush1.bf16.msra.mxu0 %v3481_v8 }
  0x26   :  { %209 = vmatprep.subr.bf16.mxu0 %v3660_v1 }
  0x27   :  { %27 = vsyncpa [#allocation5], 0  ;;  %v3483_v10 = vld [vmem:[%s4363_s23 + $0x40] sm:$0xff]   ;;  %v3484_v11 = vld [vmem:[%s4363_s23 + $0x48] sm:$0xff]   ;;  %s4365_s25 = sld [smem:[#allocation9_spill]]  ;;  %vm238_vm1 = vcmask 261120  }
  0x28   :  { %v3485_v12 = vld [vmem:[%s4363_s23 + $0x50] sm:$0xff]   ;;  %v3486_v13 = vld [vmem:[%s4363_s23 + $0x58] sm:$0xff]   ;;  %v3487_v14 = vld [vmem:[%s4364_s0] ss:$8 sps:$4 sm:$0xff]   ;;  %s4366_s3 = sld [smem:[#allocation11_spill]]  ;;  %s4367_s28 = sld [smem:[#allocation12_spill]] }
  0x29   :  { %210 = vmatpush1.bf16.msra.mxu0 %v3482_v9  ;;  %v3490_v62 = vld [vmem:[%s4333_s7] sm:$0xff]   ;;  %v3661_v63 = vmov 0.0   ;;  %v3491_v0 = vld [vmem:[%s4333_s7 + $0x8] sm:$0xff]   ;;  %vm3662_vm2 = vmmov 0   ;;  %vm402_vm3 = vcmask 64512   ;;  %s3663_s0 = smov 88  }
  0x2a   :  { %211 = vmatprep.subr.bf16.mxu0 %v3660_v1  ;;  %3080 = vmatprep.subr.bf16.mxu1 %v3661_v63  ;;  %v2862_v9 = vld [vmem:[%s4331_s5] ss:$0 sm:$0xff]  ;;  %s3665_s26 = smov 120   ;;  %vm3892_vm4 = vmpackc.low %vm402_vm3, %vm402_vm3  ;;  %vm488_vm10 = vcmask 130048   ;;  %s3667_s27 = smov 56   ;;  %vm1226_vm11 = vcmask 195584  }
  0x2b   :  { %3081 = vmatpush3.bf16.msra.mxu1 %v3490_v62  ;;  %3084 = vmatprep.mubr.msk.bf16.mxu1 %vm3662_vm2, %v3661_v63  ;;  %s3669_s4 = smov 80   ;;  %s3670_s29 = smov 112   ;;  %vm2760_vm12 = vcmask 1041409   ;;  %vm2763_vm13 = vcmask 254976  }
  0x2c   :  { %3082 = vmatprep.subr.bf16.mxu1 %v3661_v63  ;;  %s3671_s30 = smov 48   ;;  %s4354_s21 = smov 104  }
  0x2d   :  { %212 = vmatpush1.bf16.msra.mxu0 %v3483_v10  ;;  %v109_v15 = vld [vmem:[%s4365_s25] sm:$0xff]  ;;  %s4356_s1 = smov 72   ;;  %s4349_s22 = smov 40  }
  0x2e   :  { %213 = vmatprep.subr.bf16.mxu0 %v3660_v1  ;;  %v2860_v41 = vld [vmem:[%s4366_s3] ss:$0 sm:$0xff]  ;;  %s3664_s3 = smov 96   ;;  %s4350_s24 = smov 16  }
  0x2f   :  { %v2861_v43 = vld [vmem:[%s4367_s28] ss:$0 sm:$0xff]  ;;  %3083 = vmatpush3.bf16.msra.mxu1 %v3491_v0  ;;  %s4357_s28 = smov 64   ;;  %s4351_s2 = smov 8  }
  0x30   :  { %s4376_s23 = smov 24  }
  0x31   :  { %214 = vmatpush1.bf16.msra.mxu0 %v3484_v11 }
  0x32   :  { %215 = vmatprep.subr.bf16.mxu0 %v3660_v1 }
  0x35   :  { %216 = vmatpush1.bf16.msra.mxu0 %v3485_v12 }
  0x36   :  { %217 = vmatprep.subr.bf16.mxu0 %v3660_v1 }
  0x39   :  { %218 = vmatpush1.bf16.msra.mxu0 %v3486_v13  ;;  %v2863_v13 = vld [vmem:[%s4332_s6] ss:$0 sm:$0xff] }
  0x3c   :  { %228 = vmatmul.mubr.bf16.vlgmr.msra.gmra.mrb[0].mxu0 %v3487_v14 }
 0x10f   :  { %v229_v16 = vpop.f32.mrb[0].mxu0 }
 0x110   :  { %v230_v17 = vadd.f32 %v229_v16, %v109_v15  ;;  %v231_v18 = vpop.f32.mrb[1].mxu0 }
 0x111   :  { %v232_v19 = vpop.f32.mrb[2].mxu0  ;;  %v2864_v18 = vld [vmem:[%s4334_s8] ss:$0 sm:$0xff] }
 0x112   :  { %v233_v20 = vadd.f32 %v232_v19, %v109_v15  ;;  %v234_v21 = vpop.f32.mrb[3].mxu0  ;;  %v239_v22 = vsel %vm238_vm1, %v230_v17, 0.0 }
 0x113   :  { %240 = vadd.xlane.f32.xlu0 %v239_v22 }
 0x114   :  { %v242_v23 = vsel %vm238_vm1, %v233_v20, 0.0 }
 0x117   :  { %243 = vadd.xlane.f32.xlu0 %v242_v23 }
 0x1a0   :  { %v241_v24 = vpop.xlane.xlu0 %240 }
 0x1a1   :  { %v246_v25 = vmul.f32 0.03125, %v241_v24 }
 0x1a3   :  { %v248_v26 = vsub.f32 %v230_v17, %v246_v25 }
 0x1a4   :  { %v244_v27 = vpop.xlane.xlu0 %243 }
 0x1a5   :  { %v247_v28 = vmul.f32 0.03125, %v244_v27  ;;  %v250_v29 = vmul.f32 %v248_v26, %v248_v26 }
 0x1a7   :  { %v249_v30 = vsub.f32 %v233_v20, %v247_v28  ;;  %v252_v31 = vsel %vm238_vm1, %v250_v29, 0.0 }
 0x1a8   :  { %253 = vadd.xlane.f32.xlu1 %v252_v31 }
 0x1a9   :  { %v251_v32 = vmul.f32 %v249_v30, %v249_v30 }
 0x1ab   :  { %v255_v33 = vsel %vm238_vm1, %v251_v32, 0.0 }
 0x1ac   :  { %256 = vadd.xlane.f32.xlu1 %v255_v33 }
 0x235   :  { %v254_v34 = vpop.xlane.xlu1 %253 }
 0x236   :  { %v258_v35 = vmul.f32 0.03125, %v254_v34 }
 0x238   :  { %v260_v36 = vadd.f32 1e-05, %v258_v35 }
 0x239   :  { %v257_v37 = vpop.xlane.xlu1 %256 }
 0x23a   :  { %3510 = vrsqrt.f32 %v260_v36  ;;  %v259_v38 = vmul.f32 0.03125, %v257_v37 }
 0x23c   :  { %v261_v39 = vadd.f32 1e-05, %v259_v38 }
 0x23e   :  { %3512 = vrsqrt.f32 %v261_v39  ;;  %v67_v39 = vlaneseq }
 0x244   :  { %v3511_v40 = vpop.eup %3510 }
 0x245   :  { %v264_v42 = vmul.f32 %v3511_v40, %v248_v26  ;;  %v68_v40 = vshrl.u32 %v67_v39, 7 }
 0x247   :  { %v272_v44 = vmul.f32 %v2860_v41, %v264_v42  ;;  %v71_v42 = vand.u32 127, %v67_v39 }
 0x248   :  { %v3513_v45 = vpop.eup %3512 }
 0x249   :  { %v3842_v46 = vadd.f32 %v2861_v43, %v272_v44  ;;  %v265_v47 = vmul.f32 %v3513_v45, %v249_v30  ;;  %v74_v44 = vshra.s32 %v71_v42, 3  ;;  %v77_v45 = vand.u32 7, %v71_v42 }
 0x24b   :  { %v284_v48 = vsel %vm238_vm1, %v3842_v46, 0.0  ;;  %v273_v49 = vmul.f32 %v2860_v41, %v265_v47  ;;  %v69_v41 = vadd.s32 8, %v68_v40  ;;  %v72_v47 = vshra.s32 %v68_v40, 3 }
 0x24c   :  { %285 = vadd.xlane.f32.xlu0 %v284_v48  ;;  %vm78_vm6 = vcmp.lt.s32.totalorder %v77_v45, 5  ;;  %v3666_v48 = vmov -1e+30  }
 0x24d   :  { %v3846_v50 = vadd.f32 %v2861_v43, %v273_v49  ;;  %v73_v43 = vshra.s32 %v69_v41, 3  ;;  %vm75_vm7 = vcmp.eq.s32.totalorder %v72_v47, %v74_v44 }
 0x24e   :  { %vm79_vm9 = vmand %vm75_vm7, %vm78_vm6 }
 0x24f   :  { %v287_v51 = vsel %vm238_vm1, %v3846_v50, 0.0  ;;  %vm76_vm5 = vcmp.eq.s32.totalorder %v73_v43, %v74_v44 }
 0x250   :  { %288 = vadd.xlane.f32.xlu1 %v287_v51  ;;  %vm80_vm8 = vmand %vm76_vm5, %vm78_vm6  ;;  %v3910_v51 = vsel %vm79_vm9, 0.0, %v3666_v48 }
 0x251   :  { %v3908_v49 = vsel %vm80_vm8, 0.0, %v3666_v48 }
 0x2d9   :  { %v286_v52 = vpop.xlane.xlu0 %285 }
 0x2da   :  { %v290_v53 = vmul.f32 0.03125, %v286_v52 }
 0x2dc   :  { %v292_v54 = vsub.f32 %v3842_v46, %v290_v53 }
 0x2dd   :  { %v289_v55 = vpop.xlane.xlu1 %288 }
 0x2de   :  { %v291_v56 = vmul.f32 0.03125, %v289_v55  ;;  %v294_v57 = vmul.f32 %v292_v54, %v292_v54 }
 0x2e0   :  { %v293_v58 = vsub.f32 %v3846_v50, %v291_v56  ;;  %v296_v59 = vsel %vm238_vm1, %v294_v57, 0.0 }
 0x2e1   :  { %297 = vadd.xlane.f32.xlu0 %v296_v59 }
 0x2e2   :  { %v295_v60 = vmul.f32 %v293_v58, %v293_v58 }
 0x2e4   :  { %v299_v61 = vsel %vm238_vm1, %v295_v60, 0.0 }
 0x2e5   :  { %300 = vadd.xlane.f32.xlu1 %v299_v61 }
 0x36e   :  { %v298_v1 = vpop.xlane.xlu0 %297 }
 0x36f   :  { %v302_v2 = vmul.f32 0.03125, %v298_v1 }
 0x371   :  { %v304_v3 = vadd.f32 1e-05, %v302_v2 }
 0x372   :  { %v301_v4 = vpop.xlane.xlu1 %300 }
 0x373   :  { %3514 = vrsqrt.f32 %v304_v3  ;;  %v303_v5 = vmul.f32 0.03125, %v301_v4 }
 0x375   :  { %v305_v6 = vadd.f32 1e-05, %v303_v5 }
 0x377   :  { %3516 = vrsqrt.f32 %v305_v6 }
 0x37d   :  { %v3515_v7 = vpop.eup %3514 }
 0x37e   :  { %v308_v8 = vmul.f32 %v3515_v7, %v292_v54 }
 0x380   :  { %v316_v12 = vmul.f32 %v2862_v9, %v308_v8 }
 0x381   :  { %v3517_v10 = vpop.eup %3516 }
 0x382   :  { %v309_v11 = vmul.f32 %v3517_v10, %v293_v58  ;;  %v324_v15 = vadd.f32 %v2863_v13, %v316_v12 }
 0x384   :  { %v317_v14 = vmul.f32 %v2862_v9, %v309_v11 }
 0x386   :  { %v325_v16 = vadd.f32 %v2863_v13, %v317_v14 }
 0x388   :  { %v326_v17 = vpack.c.bf16 %v325_v16, %v324_v15 }
 0x38a   :  { %3085 = vmatmul.mubr.msk.bf16.vlgmr.msra.gmra.mrb[0].mxu1 %vm238_vm1, %v326_v17 }
 0x45d   :  { %v387_v19 = vpop.f32.mrb[0].mxu1 }
 0x45e   :  { %v388_v20 = vadd.f32 %v2864_v18, %v387_v19  ;;  %v3086_v21 = vpop.f32.mrb[1].mxu1 }
 0x45f   :  { %v390_v22 = vpop.f32.mrb[2].mxu1 }
 0x460   :  { %v391_v23 = vadd.f32 %v2864_v18, %v390_v22  ;;  %v3087_v24 = vpop.f32.mrb[3].mxu1  ;;  %v3874_v25 = vmul.f32 0.35355338, %v388_v20 }
 0x462   :  { %3092 = vmatprep.mubr.msk.f32.mxu1 %vm402_vm3, %v3874_v25  ;;  %v3878_v26 = vpack.i.bf16 %v391_v23, %v388_v20  ;;  %v3886_v27 = vmul.f32 0.35355338, %v391_v23 }
 0x464   :  { %3371 = vrot.lane.b32.xlu1 %v3878_v26, %s3663_s0  ;;  %3366 = vrot.lane.b32.xlu0 %v3878_v26, %s3664_s3 }
 0x468   :  { %598 = vrot.lane.b32.xlu1 %v3874_v25, %s3665_s26 }
 0x46c   :  { %600 = vrot.lane.b32.xlu1 %v3886_v27, %s3665_s26 }
 0x4d6   :  { %v3372_v28 = vpop.permute.xlu1 %3371  ;;  %v3367_v29 = vpop.permute.xlu0 %3366 }
 0x4d7   :  { %v3374_v30 = vunpack.i.h.bf16 %v3372_v28  ;;  %v3373_v31 = vunpack.i.l.bf16 %v3372_v28  ;;  %v3369_v32 = vunpack.i.h.bf16 %v3367_v29  ;;  %v3368_v33 = vunpack.i.l.bf16 %v3367_v29 }
 0x4d9   :  { %v3274_v35 = vpack.c.bf16 %v3374_v30, %v3373_v31  ;;  %v3264_v36 = vpack.c.bf16 %v3369_v32, %v3368_v33 }
 0x4da   :  { %v599_v37 = vpop.permute.xlu1 %598 }
 0x4db   :  { %3266 = vmatprep.subr.msk.bf16.mxu1 %vm3892_vm4, %v3264_v36  ;;  %3276 = vmatprep.subr.msk.bf16.mxu0 %vm3892_vm4, %v3274_v35 }
 0x4dc   :  { %3106 = vmatprep.mubr.msk.f32.mxu0 %vm402_vm3, %v599_v37  ;;  %3269 = vmatpush3.bf16.xpose.msk.msra.mxu1 %vm3892_vm4, %v3264_v36 }
 0x4dd   :  { %3279 = vmatpush3.bf16.xpose.msk.msra.mxu0 %vm3892_vm4, %v3274_v35 }
 0x4de   :  { %v601_v38 = vpop.permute.xlu1 %600 }
 0x4e3   :  { %3093 = vmatmul.mubr.msk.f32.vlgmr.msra.gmra.mrb[4].mxu1 %vm402_vm3, %v3886_v27 }
 0x4e4   :  { %3107 = vmatmul.mubr.msk.f32.vlgmr.msra.gmra.mrb[4].mxu0 %vm402_vm3, %v601_v38 }
 0x5b6   :  { %v3094_v52 = vpop.f32.mrb[4].mxu1 }
 0x5b7   :  { %v485_v53 = vadd.f32 %v3094_v52, %v3908_v49  ;;  %v3108_v54 = vpop.f32.mrb[4].mxu0  ;;  %v479_v55 = vpop.f32.mrb[5].mxu1 }
 0x5b8   :  { %v480_v56 = vadd.f32 %v479_v55, %v3910_v51  ;;  %v680_v57 = vpop.f32.mrb[5].mxu0  ;;  %v686_v61 = vadd.f32 %v3108_v54, %v3908_v49 }
 0x5b9   :  { %v492_v58 = vsel %vm488_vm10, %v485_v53, -inf  ;;  %v681_v59 = vadd.f32 %v680_v57, %v3910_v51 }
 0x5ba   :  { %493 = vmax.xlane.f32.xlu1 %v492_v58  ;;  %v489_v60 = vsel %vm488_vm10, %v480_v56, -inf  ;;  %v692_v0 = vsel %vm488_vm10, %v686_v61, -inf }
 0x5bb   :  { %490 = vmax.xlane.f32.xlu0 %v489_v60  ;;  %v689_v62 = vsel %vm488_vm10, %v681_v59, -inf }
 0x5bf   :  { %690 = vmax.xlane.f32.xlu0 %v689_v62 }
 0x5c3   :  { %693 = vmax.xlane.f32.xlu0 %v692_v0 }
 0x647   :  { %v494_v1 = vpop.xlane.xlu1 %493 }
 0x648   :  { %v496_v2 = vsub.f32 %v485_v53, %v494_v1  ;;  %v491_v3 = vpop.xlane.xlu0 %490 }
 0x649   :  { %v495_v4 = vsub.f32 %v480_v56, %v491_v3 }
 0x64a   :  { %v499_v5 = vmul.f32 1.442695, %v496_v2 }
 0x64b   :  { %v497_v6 = vmul.f32 1.442695, %v495_v4 }
 0x64c   :  { %3518 = vpow2.f32 %v499_v5  ;;  %v691_v7 = vpop.xlane.xlu0 %690 }
 0x64d   :  { %3520 = vpow2.f32 %v497_v6  ;;  %v695_v8 = vsub.f32 %v681_v59, %v691_v7 }
 0x64f   :  { %v697_v9 = vmul.f32 1.442695, %v695_v8 }
 0x650   :  { %v694_v10 = vpop.xlane.xlu0 %693 }
 0x651   :  { %3522 = vpow2.f32 %v697_v9  ;;  %v696_v11 = vsub.f32 %v686_v61, %v694_v10 }
 0x653   :  { %v699_v12 = vmul.f32 1.442695, %v696_v11 }
 0x655   :  { %3524 = vpow2.f32 %v699_v12 }
 0x656   :  { %v3519_v13 = vpop.eup %3518 }
 0x657   :  { %v3521_v14 = vpop.eup %3520  ;;  %v504_v15 = vsel %vm488_vm10, %v3519_v13, 0.0 }
 0x658   :  { %505 = vadd.xlane.f32.xlu1 %v504_v15  ;;  %v501_v16 = vsel %vm488_vm10, %v3521_v14, 0.0 }
 0x659   :  { %502 = vadd.xlane.f32.xlu0 %v501_v16 }
 0x65b   :  { %v3523_v17 = vpop.eup %3522 }
 0x65c   :  { %v701_v18 = vsel %vm488_vm10, %v3523_v17, 0.0 }
 0x65d   :  { %702 = vadd.xlane.f32.xlu0 %v701_v18 }
 0x65f   :  { %v3525_v19 = vpop.eup %3524 }
 0x660   :  { %v704_v20 = vsel %vm488_vm10, %v3525_v19, 0.0 }
 0x661   :  { %705 = vadd.xlane.f32.xlu1 %v704_v20 }
 0x672   :  { %3381 = vrot.lane.b32.xlu1 %v3878_v26, %s3667_s27 }
 0x673   :  { %3376 = vrot.lane.b32.xlu0 %v3878_v26, %s4357_s28 }
 0x676   :  { %3386 = vrot.lane.b32.xlu1 %v3878_v26, %s3669_s4 }
 0x677   :  { %800 = vrot.lane.b32.xlu0 %v3886_v27, %s3670_s29 }
 0x67a   :  { %798 = vrot.lane.b32.xlu1 %v3874_v25, %s3670_s29 }
 0x6e5   :  { %v506_v21 = vpop.xlane.xlu1 %505 }
 0x6e6   :  { %v503_v22 = vpop.xlane.xlu0 %502 }
 0x6e7   :  { %3526 = vrcp.f32 %v503_v22 }
 0x6e8   :  { %3528 = vrcp.f32 %v506_v21 }
 0x6ea   :  { %v703_v23 = vpop.xlane.xlu0 %702 }
 0x6eb   :  { %3530 = vrcp.f32 %v703_v23 }
 0x6ee   :  { %v3377_v24 = vpop.permute.xlu0 %3376  ;;  %v706_v28 = vpop.xlane.xlu1 %705 }
 0x6ef   :  { %v3379_v29 = vunpack.i.h.bf16 %v3377_v24  ;;  %v3378_v30 = vunpack.i.l.bf16 %v3377_v24  ;;  %3532 = vrcp.f32 %v706_v28 }
 0x6f1   :  { %v3527_v31 = vpop.eup %3526  ;;  %v3270_v32 = vpack.c.bf16 %v3379_v29, %v3378_v30 }
 0x6f2   :  { %v3529_v33 = vpop.eup %3528  ;;  %v3382_v35 = vpop.permute.xlu1 %3381  ;;  %v508_v36 = vmul.f32 %v3527_v31, %v3521_v14 }
 0x6f3   :  { %v3384_v37 = vunpack.i.h.bf16 %v3382_v35  ;;  %v3383_v38 = vunpack.i.l.bf16 %v3382_v35  ;;  %3271 = vmatprep.subr.bf16.mxu1 %v3270_v32  ;;  %v510_v40 = vmul.f32 %v3529_v33, %v3519_v13  ;;  %v801_v54 = vpop.permute.xlu0 %800 }
 0x6f4   :  { %3273 = vmatpush3.bf16.msra.mxu1 %v3270_v32  ;;  %3099 = vmatprep.mubr.msk.f32.mxu1 %vm488_vm10, %v508_v36 }
 0x6f5   :  { %v3531_v39 = vpop.eup %3530  ;;  %v3280_v41 = vpack.c.bf16 %v3384_v37, %v3383_v38 }
 0x6f6   :  { %v3387_v42 = vpop.permute.xlu1 %3386  ;;  %v708_v43 = vmul.f32 %v3531_v39, %v3523_v17 }
 0x6f7   :  { %v3389_v44 = vunpack.i.h.bf16 %v3387_v42  ;;  %v3388_v45 = vunpack.i.l.bf16 %v3387_v42  ;;  %3100 = vmatmul.mubr.msk.f32.vlgmr.msra.gmra.mrb[6].mxu1 %vm488_vm10, %v510_v40  ;;  %3281 = vmatprep.subr.bf16.mxu1 %v3280_v41 }
 0x6f8   :  { %3283 = vmatpush3.bf16.msra.mxu1 %v3280_v41  ;;  %3113 = vmatprep.mubr.msk.f32.mxu1 %vm488_vm10, %v708_v43 }
 0x6f9   :  { %v3533_v47 = vpop.eup %3532  ;;  %v3284_v48 = vpack.c.bf16 %v3389_v44, %v3388_v45 }
 0x6fa   :  { %v710_v52 = vmul.f32 %v3533_v47, %v3525_v19  ;;  %v799_v53 = vpop.permute.xlu1 %798 }
 0x6fb   :  { %3286 = vmatprep.subr.msk.bf16.mxu1 %vm3892_vm4, %v3284_v48 }
 0x6fc   :  { %3114 = vmatmul.mubr.msk.f32.vlgmr.msra.gmra.mrb[8].mxu1 %vm488_vm10, %v710_v52 }
 0x6fd   :  { %3120 = vmatprep.mubr.msk.f32.mxu1 %vm402_vm3, %v799_v53 }
 0x701   :  { %3289 = vmatpush3.bf16.xpose.msk.msra.mxu1 %vm3892_vm4, %v3284_v48 }
 0x708   :  { %3121 = vmatmul.mubr.msk.f32.vlgmr.msra.gmra.mrb[10].mxu1 %vm402_vm3, %v801_v54 }
 0x7ca   :  { %v3944_v55 = vpop.f32.mrb[6].mxu1 }
 0x7cb   :  { %v3946_v56 = vpop.f32.mrb[7].mxu1 }
 0x7cf   :  { %v3948_v57 = vpop.f32.mrb[8].mxu1 }
 0x7d0   :  { %v3950_v58 = vpop.f32.mrb[9].mxu1 }
 0x7d1   :  { %v3405_v59 = vpack.i.bf16 %v3948_v57, %v3950_v58  ;;  %v3492_v57 = vld [vmem:[%s4335_s9] sm:$0xff]   ;;  %v3493_v58 = vld [vmem:[%s4335_s9 + $0x8] sm:$0xff]  }
 0x7db   :  { %v3122_v60 = vpop.f32.mrb[10].mxu1 }
 0x7dc   :  { %v886_v61 = vadd.f32 %v3122_v60, %v3908_v49  ;;  %v880_v62 = vpop.f32.mrb[11].mxu1 }
 0x7dd   :  { %v881_v0 = vadd.f32 %v880_v62, %v3910_v51 }
 0x7de   :  { %v892_v1 = vsel %vm488_vm10, %v886_v61, -inf }
 0x7df   :  { %893 = vmax.xlane.f32.xlu0 %v892_v1  ;;  %v889_v2 = vsel %vm488_vm10, %v881_v0, -inf }
 0x7e0   :  { %890 = vmax.xlane.f32.xlu1 %v889_v2 }
 0x7f1   :  { %3391 = vrot.lane.b32.xlu1 %v3878_v26, %s3671_s30 }
 0x7f5   :  { %998 = vrot.lane.b32.xlu1 %v3874_v25, %s4354_s21 }
 0x7f9   :  { %1000 = vrot.lane.b32.xlu1 %v3886_v27, %s4354_s21 }
 0x86c   :  { %v894_v3 = vpop.xlane.xlu0 %893 }
 0x86d   :  { %v896_v4 = vsub.f32 %v886_v61, %v894_v3  ;;  %v891_v5 = vpop.xlane.xlu1 %890 }
 0x86e   :  { %v895_v6 = vsub.f32 %v881_v0, %v891_v5 }
 0x86f   :  { %v899_v7 = vmul.f32 1.442695, %v896_v4 }
 0x870   :  { %v897_v8 = vmul.f32 1.442695, %v895_v6 }
 0x871   :  { %3534 = vpow2.f32 %v899_v7  ;;  %v3392_v9 = vpop.permute.xlu1 %3391 }
 0x872   :  { %v3394_v10 = vunpack.i.h.bf16 %v3392_v9  ;;  %v3393_v11 = vunpack.i.l.bf16 %v3392_v9  ;;  %3536 = vpow2.f32 %v897_v8 }
 0x874   :  { %v3290_v12 = vpack.c.bf16 %v3394_v10, %v3393_v11 }
 0x875   :  { %v999_v28 = vpop.permute.xlu1 %998 }
 0x876   :  { %3291 = vmatprep.subr.bf16.mxu1 %v3290_v12 }
 0x877   :  { %3293 = vmatpush3.bf16.msra.mxu1 %v3290_v12 }
 0x879   :  { %v1001_v29 = vpop.permute.xlu1 %1000 }
 0x87b   :  { %v3535_v13 = vpop.eup %3534 }
 0x87c   :  { %v904_v25 = vsel %vm488_vm10, %v3535_v13, 0.0  ;;  %v3537_v14 = vpop.eup %3536 }
 0x87d   :  { %905 = vadd.xlane.f32.xlu0 %v904_v25  ;;  %v901_v27 = vsel %vm488_vm10, %v3537_v14, 0.0 }
 0x881   :  { %902 = vadd.xlane.f32.xlu0 %v901_v27 }
 0x897   :  { %3396 = vrot.lane.b32.xlu0 %v3878_v26, %s4356_s1 }
 0x90a   :  { %v906_v15 = vpop.xlane.xlu0 %905 }
 0x90b   :  { %3538 = vrcp.f32 %v906_v15 }
 0x90e   :  { %v903_v16 = vpop.xlane.xlu0 %902 }
 0x90f   :  { %3540 = vrcp.f32 %v903_v16 }
 0x912   :  { %v3397_v17 = vpop.permute.xlu0 %3396 }
 0x913   :  { %v3399_v18 = vunpack.i.h.bf16 %v3397_v17  ;;  %v3398_v19 = vunpack.i.l.bf16 %v3397_v17 }
 0x915   :  { %v3294_v20 = vpack.c.bf16 %v3399_v18, %v3398_v19  ;;  %v3539_v21 = vpop.eup %3538 }
 0x916   :  { %v910_v24 = vmul.f32 %v3539_v21, %v3535_v13 }
 0x917   :  { %3296 = vmatprep.subr.msk.bf16.mxu1 %vm3892_vm4, %v3294_v20 }
 0x919   :  { %v3541_v22 = vpop.eup %3540 }
 0x91a   :  { %v908_v23 = vmul.f32 %v3541_v22, %v3537_v14 }
 0x91c   :  { %3127 = vmatprep.mubr.msk.f32.mxu1 %vm488_vm10, %v908_v23 }
 0x91d   :  { %3128 = vmatmul.mubr.msk.f32.vlgmr.msra.gmra.mrb[12].mxu1 %vm488_vm10, %v910_v24 }
 0x91e   :  { %3299 = vmatpush3.bf16.xpose.msk.msra.mxu1 %vm3892_vm4, %v3294_v20  ;;  %3134 = vmatprep.mubr.msk.f32.mxu1 %vm402_vm3, %v999_v28 }
 0x91f   :  { %3144 = vmatprep.subr.bf16.mxu1 %v3661_v63 }
 0x925   :  { %3135 = vmatmul.mubr.msk.f32.vlgmr.msra.gmra.mrb[14].mxu1 %vm402_vm3, %v1001_v29 }
 0x926   :  { %3148 = vmatprep.mubr.msk.bf16.mxu1 %vm3662_vm2, %v3661_v63  ;;  %3145 = vmatpush3.bf16.msra.mxu1 %v3492_v57 }
 0x927   :  { %3146 = vmatprep.subr.bf16.mxu1 %v3661_v63 }
 0x92a   :  { %3147 = vmatpush3.bf16.msra.mxu1 %v3493_v58  ;;  %v3496_v58 = vld [vmem:[%s4341_s15] sm:$0xff]  }
 0x92b   :  { %3160 = vmatprep.subr.bf16.mxu1 %v3661_v63 }
 0x9f0   :  { %v3129_v30 = vpop.f32.mrb[12].mxu1 }
 0x9f1   :  { %v989_v31 = vpop.f32.mrb[13].mxu1 }
 0x9f2   :  { %v3410_v32 = vpack.i.bf16 %v3129_v30, %v989_v31 }
 0x9f8   :  { %v3136_v33 = vpop.f32.mrb[14].mxu1 }
 0x9f9   :  { %v1086_v35 = vadd.f32 %v3136_v33, %v3908_v49  ;;  %v1080_v36 = vpop.f32.mrb[15].mxu1 }
 0x9fa   :  { %v1081_v37 = vadd.f32 %v1080_v36, %v3910_v51 }
 0x9fb   :  { %v1092_v38 = vsel %vm488_vm10, %v1086_v35, -inf }
 0x9fc   :  { %1093 = vmax.xlane.f32.xlu0 %v1092_v38  ;;  %v1089_v39 = vsel %vm488_vm10, %v1081_v37, -inf }
 0x9fd   :  { %1090 = vmax.xlane.f32.xlu1 %v1089_v39 }
 0xa0e   :  { %3401 = vrot.lane.b32.xlu1 %v3878_v26, %s4349_s22 }
 0xa12   :  { %3411 = vrot.lane.b32.xlu1 %v3410_v32, %s4350_s24 }
 0xa89   :  { %v1094_v40 = vpop.xlane.xlu0 %1093 }
 0xa8a   :  { %v1096_v41 = vsub.f32 %v1086_v35, %v1094_v40  ;;  %v1091_v42 = vpop.xlane.xlu1 %1090 }
 0xa8b   :  { %v1095_v43 = vsub.f32 %v1081_v37, %v1091_v42  ;;  %v3494_v42 = vld [vmem:[%s4339_s13] sm:$0xff]  }
 0xa8c   :  { %v1099_v44 = vmul.f32 1.442695, %v1096_v41 }
 0xa8d   :  { %v1097_v45 = vmul.f32 1.442695, %v1095_v43  ;;  %v3495_v43 = vld [vmem:[%s4339_s13 + $0x8] sm:$0xff]  }
 0xa8e   :  { %v3402_v47 = vpop.permute.xlu1 %3401 }
 0xa8f   :  { %3542 = vpow2.f32 %v1097_v45  ;;  %v3404_v48 = vunpack.i.h.bf16 %v3402_v47  ;;  %v3403_v52 = vunpack.i.l.bf16 %v3402_v47 }
 0xa90   :  { %3544 = vpow2.f32 %v1099_v44 }
 0xa91   :  { %v3300_v53 = vpack.c.bf16 %v3404_v48, %v3403_v52 }
 0xa92   :  { %v3412_v10 = vpop.permute.xlu1 %3411 }
 0xa93   :  { %3301 = vmatprep.subr.bf16.mxu0 %v3300_v53  ;;  %v3414_v13 = vunpack.i.h.bf16 %v3412_v10  ;;  %v3413_v25 = vunpack.i.l.bf16 %v3412_v10 }
 0xa94   :  { %3303 = vmatpush3.bf16.msra.mxu0 %v3300_v53 }
 0xa95   :  { %3152 = vmatprep.subr.bf16.mxu0 %v3661_v63 }
 0xa99   :  { %v3543_v26 = vpop.eup %3542 }
 0xa9a   :  { %v1101_v54 = vsel %vm488_vm10, %v3543_v26, 0.0  ;;  %v3545_v60 = vpop.eup %3544 }
 0xa9b   :  { %1102 = vadd.xlane.f32.xlu0 %v1101_v54  ;;  %v1104_v61 = vsel %vm488_vm10, %v3545_v60, 0.0 }
 0xa9f   :  { %1105 = vadd.xlane.f32.xlu0 %v1104_v61 }
 0xab5   :  { %3406 = vrot.lane.b32.xlu0 %v3405_v59, %s4351_s2  ;;  %s4353_s2 = smov 24  }
 0xb28   :  { %v1103_v62 = vpop.xlane.xlu0 %1102 }
 0xb29   :  { %3546 = vrcp.f32 %v1103_v62 }
 0xb2c   :  { %v1106_v0 = vpop.xlane.xlu0 %1105 }
 0xb2d   :  { %3548 = vrcp.f32 %v1106_v0 }
 0xb30   :  { %v3407_v7 = vpop.permute.xlu0 %3406 }
 0xb31   :  { %v3409_v8 = vunpack.i.h.bf16 %v3407_v7  ;;  %v3408_v9 = vunpack.i.l.bf16 %v3407_v7  ;;  %v2898_v7 = vld [vmem:[%s4340_s14] ss:$0 sm:$0xff] }
 0xb33   :  { %v3547_v1 = vpop.eup %3546  ;;  %v1223_v11 = vsel %vm402_vm3, %v3944_v55, %v3409_v8  ;;  %v1222_v12 = vsel %vm402_vm3, %v3946_v56, %v3408_v9  ;;  %v2892_v55 = vld [vmem:[%s4336_s10] ss:$0 sm:$0xff] }
 0xb34   :  { %v1108_v2 = vmul.f32 %v3547_v1, %v3543_v26  ;;  %v1224_v16 = vsel %vm488_vm10, %v1222_v12, %v3413_v25  ;;  %v1225_v17 = vsel %vm488_vm10, %v1223_v11, %v3414_v13  ;;  %v2897_v1 = vld [vmem:[%s4338_s12] ss:$0 sm:$0xff] }
 0xb36   :  { %3141 = vmatprep.mubr.msk.f32.mxu0 %vm488_vm10, %v1108_v2 }
 0xb37   :  { %v3549_v3 = vpop.eup %3548 }
 0xb38   :  { %v1110_v4 = vmul.f32 %v3549_v3, %v3545_v60  ;;  %v2896_v60 = vld [vmem:[%s4337_s11] ss:$0 sm:$0xff] }
 0xb3a   :  { %3142 = vmatmul.mubr.msk.f32.vlgmr.msra.gmra.mrb[6].mxu0 %vm488_vm10, %v1110_v4 }
 0xb3b   :  { %3156 = vmatprep.mubr.msk.bf16.mxu0 %vm3662_vm2, %v3661_v63  ;;  %3153 = vmatpush3.bf16.msra.mxu0 %v3494_v42 }
 0xb3c   :  { %3154 = vmatprep.subr.bf16.mxu0 %v3661_v63 }
 0xb3f   :  { %3155 = vmatpush3.bf16.msra.mxu0 %v3495_v43 }
 0xb40   :  { %3172 = vmatprep.subr.bf16.mxu0 %v3661_v63 }
 0xc0d   :  { %v3143_v59 = vpop.f32.mrb[6].mxu0 }
 0xc0e   :  { %v1189_v5 = vpop.f32.mrb[7].mxu0 }
 0xc0f   :  { %v3415_v6 = vpack.i.bf16 %v3143_v59, %v1189_v5  ;;  %v3497_v59 = vld [vmem:[%s4341_s15 + $0x8] sm:$0xff]   ;;  %v3498_v5 = vld [vmem:[%s4341_s15 + $0x10] sm:$0xff]  }
 0xc11   :  { %3416 = vrot.lane.b32.xlu1 %v3415_v6, %s4353_s2  ;;  %v3499_v6 = vld [vmem:[%s4341_s15 + $0x18] sm:$0xff]  }
 0xc83   :  { %v3417_v14 = vpop.permute.xlu1 %3416 }
 0xc84   :  { %v3419_v27 = vunpack.i.h.bf16 %v3417_v14  ;;  %v3418_v15 = vunpack.i.l.bf16 %v3417_v14 }
 0xc86   :  { %v1228_v18 = vsel %vm1226_vm11, %v1225_v17, %v3419_v27  ;;  %v1227_v19 = vsel %vm1226_vm11, %v1224_v16, %v3418_v15 }
 0xc87   :  { %v1229_v20 = vpack.c.bf16 %v1228_v18, %v1227_v19 }
 0xc89   :  { %3149 = vmatmul.mubr.msk.bf16.vlgmr.msra.gmra.mrb[16].mxu1 %vm238_vm1, %v1229_v20 }
 0xc8a   :  { %3168 = vmatprep.mubr.msk.bf16.mxu1 %vm3662_vm2, %v3661_v63  ;;  %3161 = vmatpush3.bf16.msra.mxu1 %v3496_v58 }
 0xc8b   :  { %3162 = vmatprep.subr.bf16.mxu1 %v3661_v63 }
 0xc8e   :  { %3163 = vmatpush3.bf16.msra.mxu1 %v3497_v59 }
 0xc8f   :  { %3164 = vmatprep.subr.bf16.mxu1 %v3661_v63 }
 0xc92   :  { %3165 = vmatpush3.bf16.msra.mxu1 %v3498_v5 }
 0xc93   :  { %3166 = vmatprep.subr.bf16.mxu1 %v3661_v63 }
 0xc96   :  { %3167 = vmatpush3.bf16.msra.mxu1 %v3499_v6 }
 0xd5c   :  { %v1290_v56 = vpop.f32.mrb[16].mxu1 }
 0xd5d   :  { %v1291_v21 = vadd.f32 %v2892_v55, %v1290_v56  ;;  %v3150_v22 = vpop.f32.mrb[17].mxu1 }
 0xd5e   :  { %v1293_v23 = vpop.f32.mrb[18].mxu1 }
 0xd5f   :  { %v4021_v24 = vadd.f32 %v1291_v21, %v3842_v46  ;;  %v1294_v28 = vadd.f32 %v2892_v55, %v1293_v23  ;;  %v3151_v29 = vpop.f32.mrb[19].mxu1  ;;  %v2904_v23 = vld [vmem:[%s4342_s16] ss:$0 sm:$0xff] }
 0xd61   :  { %v4024_v30 = vadd.f32 %v1294_v28, %v3846_v50  ;;  %v1301_v31 = vsel %vm238_vm1, %v4021_v24, 0.0 }
 0xd62   :  { %1302 = vadd.xlane.f32.xlu1 %v1301_v31 }
 0xd63   :  { %v1304_v32 = vsel %vm238_vm1, %v4024_v30, 0.0 }
 0xd64   :  { %1305 = vadd.xlane.f32.xlu0 %v1304_v32 }
 0xdef   :  { %v1303_v33 = vpop.xlane.xlu1 %1302 }
 0xdf0   :  { %v1307_v35 = vmul.f32 0.03125, %v1303_v33 }
 0xdf1   :  { %v1306_v36 = vpop.xlane.xlu0 %1305 }
 0xdf2   :  { %v1309_v37 = vsub.f32 %v4021_v24, %v1307_v35  ;;  %v1308_v46 = vmul.f32 0.03125, %v1306_v36 }
 0xdf4   :  { %v1310_v38 = vsub.f32 %v4024_v30, %v1308_v46  ;;  %v1311_v39 = vmul.f32 %v1309_v37, %v1309_v37 }
 0xdf6   :  { %v1313_v50 = vsel %vm238_vm1, %v1311_v39, 0.0  ;;  %v1312_v40 = vmul.f32 %v1310_v38, %v1310_v38 }
 0xdf7   :  { %1314 = vadd.xlane.f32.xlu0 %v1313_v50 }
 0xdf8   :  { %v1316_v41 = vsel %vm238_vm1, %v1312_v40, 0.0 }
 0xdfb   :  { %1317 = vadd.xlane.f32.xlu0 %v1316_v41 }
 0xe84   :  { %v1315_v44 = vpop.xlane.xlu0 %1314 }
 0xe85   :  { %v1319_v45 = vmul.f32 0.03125, %v1315_v44 }
 0xe87   :  { %v1321_v47 = vadd.f32 1e-05, %v1319_v45 }
 0xe88   :  { %v1318_v48 = vpop.xlane.xlu0 %1317 }
 0xe89   :  { %3550 = vrsqrt.f32 %v1321_v47  ;;  %v1320_v52 = vmul.f32 0.03125, %v1318_v48  ;;  %v3500_v47 = vld [vmem:[%s4333_s7 + $0x10] sm:$0xff]   ;;  %v3501_v48 = vld [vmem:[%s4333_s7 + $0x18] sm:$0xff]  }
 0xe8b   :  { %v1322_v53 = vadd.f32 1e-05, %v1320_v52 }
 0xe8d   :  { %3552 = vrsqrt.f32 %v1322_v53 }
 0xe93   :  { %v3551_v26 = vpop.eup %3550 }
 0xe94   :  { %v1325_v54 = vmul.f32 %v3551_v26, %v1309_v37 }
 0xe96   :  { %v1333_v62 = vmul.f32 %v2896_v60, %v1325_v54 }
 0xe97   :  { %v3553_v61 = vpop.eup %3552 }
 0xe98   :  { %v1326_v0 = vmul.f32 %v3553_v61, %v1310_v38  ;;  %v1341_v3 = vadd.f32 %v2897_v1, %v1333_v62 }
 0xe9a   :  { %v1334_v2 = vmul.f32 %v2896_v60, %v1326_v0  ;;  %v2912_v0 = vld [vmem:[%s4331_s5 + $0x1] ss:$0 sm:$0xff]  ;;  %s4370_s5 = smov 64  }
 0xe9c   :  { %v1342_v4 = vadd.f32 %v2897_v1, %v1334_v2 }
 0xe9e   :  { %v1343_v57 = vpack.c.bf16 %v1342_v4, %v1341_v3 }
 0xea0   :  { %3157 = vmatmul.mubr.msk.bf16.vlgmr.msra.gmra.mrb[8].mxu0 %vm238_vm1, %v1343_v57  ;;  %v2913_v57 = vld [vmem:[%s4332_s6 + $0x1] ss:$0 sm:$0xff]  ;;  %s4371_s6 = smov 72  }
 0xea1   :  { %3176 = vmatprep.mubr.msk.bf16.mxu0 %vm3662_vm2, %v3661_v63  ;;  %3173 = vmatpush3.bf16.msra.mxu0 %v3500_v47 }
 0xea2   :  { %3174 = vmatprep.subr.bf16.mxu0 %v3661_v63 }
 0xea5   :  { %3175 = vmatpush3.bf16.msra.mxu0 %v3501_v48 }
 0xf73   :  { %v1404_v8 = vpop.f32.mrb[8].mxu0 }
 0xf74   :  { %v1405_v9 = vadd.f32 %v2898_v7, %v1404_v8  ;;  %v3158_v10 = vpop.f32.mrb[9].mxu0 }
 0xf75   :  { %v1407_v11 = vpop.f32.mrb[10].mxu0 }
 0xf76   :  { %v2902_v12 = vmul.f32 -1.702, %v1405_v9  ;;  %v1408_v13 = vadd.f32 %v2898_v7, %v1407_v11  ;;  %v3159_v25 = vpop.f32.mrb[11].mxu0  ;;  %v2919_v7 = vld [vmem:[%s4334_s8 + $0x1] ss:$0 sm:$0xff]  ;;  %s4372_s8 = smov 104  }
 0xf78   :  { %v1415_v14 = vmul.f32 1.442695, %v2902_v12  ;;  %v2903_v27 = vmul.f32 -1.702, %v1408_v13 }
 0xf7a   :  { %3554 = vpow2.f32 %v1415_v14  ;;  %v1417_v15 = vmul.f32 1.442695, %v2903_v27 }
 0xf7c   :  { %3556 = vpow2.f32 %v1417_v15 }
 0xf84   :  { %v3555_v16 = vpop.eup %3554 }
 0xf85   :  { %v1419_v17 = vadd.f32 1.0, %v3555_v16 }
 0xf86   :  { %v3557_v18 = vpop.eup %3556 }
 0xf87   :  { %3558 = vrcp.f32 %v1419_v17  ;;  %v1420_v19 = vadd.f32 1.0, %v3557_v18 }
 0xf89   :  { %3560 = vrcp.f32 %v1420_v19 }
 0xf91   :  { %v3559_v20 = vpop.eup %3558 }
 0xf92   :  { %v1425_v56 = vmul.f32 %v3559_v20, %v1405_v9 }
 0xf93   :  { %v3561_v55 = vpop.eup %3560 }
 0xf94   :  { %v1426_v21 = vmul.f32 %v3561_v55, %v1408_v13 }
 0xf96   :  { %v1427_v22 = vpack.c.bf16 %v1426_v21, %v1425_v56 }
 0xf98   :  { %3169 = vmatmul.mubr.msk.bf16.vlgmr.msra.gmra.mrb[20].mxu1 %vm191_vm0, %v1427_v22 }
0x106b   :  { %v1504_v28 = vpop.f32.mrb[20].mxu1 }
0x106c   :  { %v1505_v29 = vadd.f32 %v2904_v23, %v1504_v28  ;;  %v3170_v31 = vpop.f32.mrb[21].mxu1 }
0x106d   :  { %v1507_v32 = vpop.f32.mrb[22].mxu1 }
0x106e   :  { %v4074_v33 = vadd.f32 %v1505_v29, %v4021_v24  ;;  %v1508_v35 = vadd.f32 %v2904_v23, %v1507_v32  ;;  %v3171_v36 = vpop.f32.mrb[23].mxu1 }
0x1070   :  { %v4077_v37 = vadd.f32 %v1508_v35, %v4024_v30  ;;  %v1517_v46 = vsel %vm238_vm1, %v4074_v33, 0.0 }
0x1071   :  { %1518 = vadd.xlane.f32.xlu1 %v1517_v46 }
0x1072   :  { %v1520_v38 = vsel %vm238_vm1, %v4077_v37, 0.0 }
0x1073   :  { %1521 = vadd.xlane.f32.xlu0 %v1520_v38 }
0x10fe   :  { %v1519_v39 = vpop.xlane.xlu1 %1518 }
0x10ff   :  { %v1523_v50 = vmul.f32 0.03125, %v1519_v39 }
0x1100   :  { %v1522_v40 = vpop.xlane.xlu0 %1521 }
0x1101   :  { %v1525_v41 = vsub.f32 %v4074_v33, %v1523_v50  ;;  %v1524_v24 = vmul.f32 0.03125, %v1522_v40 }
0x1103   :  { %v1526_v42 = vsub.f32 %v4077_v37, %v1524_v24  ;;  %v1527_v43 = vmul.f32 %v1525_v41, %v1525_v41 }
0x1105   :  { %v1529_v30 = vsel %vm238_vm1, %v1527_v43, 0.0  ;;  %v1528_v44 = vmul.f32 %v1526_v42, %v1526_v42 }
0x1106   :  { %1530 = vadd.xlane.f32.xlu1 %v1529_v30 }
0x1107   :  { %v1532_v45 = vsel %vm238_vm1, %v1528_v44, 0.0 }
0x1108   :  { %1533 = vadd.xlane.f32.xlu0 %v1532_v45 }
0x1193   :  { %v1531_v52 = vpop.xlane.xlu1 %1530 }
0x1194   :  { %v1535_v53 = vmul.f32 0.03125, %v1531_v52 }
0x1195   :  { %v1534_v26 = vpop.xlane.xlu0 %1533 }
0x1196   :  { %v1537_v54 = vadd.f32 1e-05, %v1535_v53  ;;  %v1536_v60 = vmul.f32 0.03125, %v1534_v26 }
0x1198   :  { %3562 = vrsqrt.f32 %v1537_v54  ;;  %v1538_v61 = vadd.f32 1e-05, %v1536_v60 }
0x119a   :  { %3564 = vrsqrt.f32 %v1538_v61 }
0x11a2   :  { %v3563_v62 = vpop.eup %3562 }
0x11a3   :  { %v1541_v1 = vmul.f32 %v3563_v62, %v1525_v41 }
0x11a4   :  { %v3565_v2 = vpop.eup %3564 }
0x11a5   :  { %v1549_v3 = vmul.f32 %v2912_v0, %v1541_v1  ;;  %v1542_v4 = vmul.f32 %v3565_v2, %v1526_v42 }
0x11a7   :  { %v1550_v58 = vmul.f32 %v2912_v0, %v1542_v4  ;;  %v1557_v59 = vadd.f32 %v2913_v57, %v1549_v3 }
0x11a9   :  { %v1558_v5 = vadd.f32 %v2913_v57, %v1550_v58 }
0x11ab   :  { %v1559_v6 = vpack.c.bf16 %v1558_v5, %v1557_v59 }
0x11ad   :  { %3177 = vmatmul.mubr.msk.bf16.vlgmr.msra.gmra.mrb[12].mxu0 %vm238_vm1, %v1559_v6 }
0x1280   :  { %v1622_v8 = vpop.f32.mrb[12].mxu0 }
0x1281   :  { %v1623_v9 = vadd.f32 %v2919_v7, %v1622_v8  ;;  %v3178_v10 = vpop.f32.mrb[13].mxu0 }
0x1282   :  { %v1625_v11 = vpop.f32.mrb[14].mxu0 }
0x1283   :  { %v1626_v12 = vadd.f32 %v2919_v7, %v1625_v11  ;;  %v3179_v13 = vpop.f32.mrb[15].mxu0  ;;  %v4104_v25 = vmul.f32 0.35355338, %v1623_v9 }
0x1285   :  { %3184 = vmatprep.mubr.msk.f32.mxu0 %vm402_vm3, %v4104_v25  ;;  %v4108_v14 = vpack.i.bf16 %v1626_v12, %v1623_v9  ;;  %v4120_v27 = vmul.f32 0.35355338, %v1626_v12 }
0x1287   :  { %3426 = vrot.lane.b32.xlu0 %v4108_v14, %s3663_s0  ;;  %3421 = vrot.lane.b32.xlu1 %v4108_v14, %s3664_s3  ;;  %s4373_s0 = smov 8   ;;  %s4374_s3 = smov 16  }
0x128b   :  { %2031 = vrot.lane.b32.xlu0 %v4104_v25, %s3670_s29  ;;  %1831 = vrot.lane.b32.xlu1 %v4104_v25, %s3665_s26 }
0x128f   :  { %3431 = vrot.lane.b32.xlu1 %v4108_v14, %s3669_s4 }
0x1293   :  { %1833 = vrot.lane.b32.xlu1 %v4120_v27, %s3665_s26  ;;  %s4375_s26 = smov 40  }
0x1297   :  { %2033 = vrot.lane.b32.xlu1 %v4120_v27, %s3670_s29 }
0x12f9   :  { %v3427_v15 = vpop.permute.xlu0 %3426  ;;  %v3422_v16 = vpop.permute.xlu1 %3421 }
0x12fa   :  { %v3429_v17 = vunpack.i.h.bf16 %v3427_v15  ;;  %v3428_v18 = vunpack.i.l.bf16 %v3427_v15  ;;  %v3424_v19 = vunpack.i.h.bf16 %v3422_v16  ;;  %v3423_v20 = vunpack.i.l.bf16 %v3422_v16 }
0x12fc   :  { %v3314_v55 = vpack.c.bf16 %v3429_v17, %v3428_v18  ;;  %v3304_v56 = vpack.c.bf16 %v3424_v19, %v3423_v20 }
0x12fd   :  { %v1832_v21 = vpop.permute.xlu1 %1831  ;;  %v2032_v32 = vpop.permute.xlu0 %2031 }
0x12fe   :  { %3306 = vmatprep.subr.msk.bf16.mxu0 %vm3892_vm4, %v3304_v56  ;;  %3316 = vmatprep.subr.msk.bf16.mxu1 %vm3892_vm4, %v3314_v55 }
0x12ff   :  { %3198 = vmatprep.mubr.msk.f32.mxu1 %vm402_vm3, %v1832_v21  ;;  %3309 = vmatpush3.bf16.xpose.msk.msra.mxu0 %vm3892_vm4, %v3304_v56 }
0x1300   :  { %3319 = vmatpush3.bf16.xpose.msk.msra.mxu1 %vm3892_vm4, %v3314_v55 }
0x1301   :  { %v3432_v22 = vpop.permute.xlu1 %3431 }
0x1302   :  { %v3434_v23 = vunpack.i.h.bf16 %v3432_v22  ;;  %v3433_v28 = vunpack.i.l.bf16 %v3432_v22 }
0x1304   :  { %v3324_v29 = vpack.c.bf16 %v3434_v23, %v3433_v28 }
0x1305   :  { %v1834_v31 = vpop.permute.xlu1 %1833 }
0x1306   :  { %3185 = vmatmul.mubr.msk.f32.vlgmr.msra.gmra.mrb[16].mxu0 %vm402_vm3, %v4120_v27  ;;  %3326 = vmatprep.subr.msk.bf16.mxu1 %vm3892_vm4, %v3324_v29 }
0x1307   :  { %3199 = vmatmul.mubr.msk.f32.vlgmr.msra.gmra.mrb[24].mxu1 %vm402_vm3, %v1834_v31 }
0x1308   :  { %3329 = vmatpush3.bf16.xpose.msk.msra.mxu1 %vm3892_vm4, %v3324_v29  ;;  %3212 = vmatprep.mubr.msk.f32.mxu1 %vm402_vm3, %v2032_v32 }
0x1309   :  { %v2034_v35 = vpop.permute.xlu1 %2033 }
0x130f   :  { %3213 = vmatmul.mubr.msk.f32.vlgmr.msra.gmra.mrb[26].mxu1 %vm402_vm3, %v2034_v35 }
0x13d9   :  { %v3186_v36 = vpop.f32.mrb[16].mxu0 }
0x13da   :  { %v1719_v46 = vadd.f32 %v3186_v36, %v3908_v49  ;;  %v3200_v38 = vpop.f32.mrb[24].mxu1  ;;  %v1713_v39 = vpop.f32.mrb[17].mxu0 }
0x13db   :  { %v1714_v50 = vadd.f32 %v1713_v39, %v3910_v51  ;;  %v1913_v40 = vpop.f32.mrb[25].mxu1  ;;  %v1919_v43 = vadd.f32 %v3200_v38, %v3908_v49 }
0x13dc   :  { %v1725_v41 = vsel %vm488_vm10, %v1719_v46, -inf  ;;  %v1914_v24 = vadd.f32 %v1913_v40, %v3910_v51 }
0x13dd   :  { %1726 = vmax.xlane.f32.xlu1 %v1725_v41  ;;  %v1722_v42 = vsel %vm488_vm10, %v1714_v50, -inf  ;;  %v1925_v53 = vsel %vm488_vm10, %v1919_v43, -inf }
0x13de   :  { %1723 = vmax.xlane.f32.xlu0 %v1722_v42  ;;  %v1922_v30 = vsel %vm488_vm10, %v1914_v24, -inf }
0x13e2   :  { %v3214_v44 = vpop.f32.mrb[26].mxu1  ;;  %1923 = vmax.xlane.f32.xlu0 %v1922_v30 }
0x13e3   :  { %v2119_v45 = vadd.f32 %v3214_v44, %v3908_v49  ;;  %v2113_v47 = vpop.f32.mrb[27].mxu1 }
0x13e4   :  { %v2114_v48 = vadd.f32 %v2113_v47, %v3910_v51 }
0x13e5   :  { %v2125_v52 = vsel %vm488_vm10, %v2119_v45, -inf }
0x13e6   :  { %2126 = vmax.xlane.f32.xlu1 %v2125_v52  ;;  %1926 = vmax.xlane.f32.xlu0 %v1925_v53  ;;  %v2122_v26 = vsel %vm488_vm10, %v2114_v48, -inf }
0x13ea   :  { %2123 = vmax.xlane.f32.xlu0 %v2122_v26 }
0x146a   :  { %v1727_v54 = vpop.xlane.xlu1 %1726 }
0x146b   :  { %v1729_v60 = vsub.f32 %v1719_v46, %v1727_v54  ;;  %v1724_v61 = vpop.xlane.xlu0 %1723 }
0x146c   :  { %v1728_v62 = vsub.f32 %v1714_v50, %v1724_v61 }
0x146d   :  { %v1732_v0 = vmul.f32 1.442695, %v1729_v60 }
0x146e   :  { %v1730_v1 = vmul.f32 1.442695, %v1728_v62 }
0x146f   :  { %3566 = vpow2.f32 %v1732_v0  ;;  %v1924_v2 = vpop.xlane.xlu0 %1923 }
0x1470   :  { %3568 = vpow2.f32 %v1730_v1  ;;  %v1928_v3 = vsub.f32 %v1914_v24, %v1924_v2 }
0x1472   :  { %v1930_v4 = vmul.f32 1.442695, %v1928_v3 }
0x1473   :  { %v2127_v57 = vpop.xlane.xlu1 %2126  ;;  %v1927_v58 = vpop.xlane.xlu0 %1926 }
0x1474   :  { %3570 = vpow2.f32 %v1930_v4  ;;  %v2129_v59 = vsub.f32 %v2119_v45, %v2127_v57  ;;  %v1929_v5 = vsub.f32 %v1919_v43, %v1927_v58 }
0x1476   :  { %v1932_v6 = vmul.f32 1.442695, %v1929_v5  ;;  %v2132_v7 = vmul.f32 1.442695, %v2129_v59 }
0x1477   :  { %v2124_v8 = vpop.xlane.xlu0 %2123 }
0x1478   :  { %v2128_v9 = vsub.f32 %v2114_v48, %v2124_v8  ;;  %3572 = vpow2.f32 %v1932_v6 }
0x1479   :  { %v3567_v10 = vpop.eup %3566  ;;  %3574 = vpow2.f32 %v2132_v7 }
0x147a   :  { %v3569_v11 = vpop.eup %3568  ;;  %v2130_v12 = vmul.f32 1.442695, %v2128_v9  ;;  %v1737_v13 = vsel %vm488_vm10, %v3567_v10, 0.0 }
0x147b   :  { %1738 = vadd.xlane.f32.xlu1 %v1737_v13  ;;  %v1734_v15 = vsel %vm488_vm10, %v3569_v11, 0.0 }
0x147c   :  { %3576 = vpow2.f32 %v2130_v12  ;;  %1735 = vadd.xlane.f32.xlu0 %v1734_v15 }
0x147e   :  { %v3571_v16 = vpop.eup %3570 }
0x147f   :  { %v1934_v17 = vsel %vm488_vm10, %v3571_v16, 0.0 }
0x1480   :  { %1935 = vadd.xlane.f32.xlu0 %v1934_v17 }
0x1482   :  { %v3573_v18 = vpop.eup %3572 }
0x1483   :  { %v1937_v19 = vsel %vm488_vm10, %v3573_v18, 0.0  ;;  %v4160_v20 = vpop.eup %3574 }
0x1484   :  { %1938 = vadd.xlane.f32.xlu1 %v1937_v19  ;;  %v2137_v21 = vsel %vm488_vm10, %v4160_v20, 0.0 }
0x1486   :  { %v3577_v55 = vpop.eup %3576 }
0x1487   :  { %v2134_v56 = vsel %vm488_vm10, %v3577_v55, 0.0 }
0x1488   :  { %2135 = vadd.xlane.f32.xlu0 %v2134_v56  ;;  %2138 = vadd.xlane.f32.xlu1 %v2137_v21 }
0x1499   :  { %3441 = vrot.lane.b32.xlu1 %v4108_v14, %s3667_s27 }
0x149d   :  { %3446 = vrot.lane.b32.xlu1 %v4108_v14, %s3671_s30 }
0x149e   :  { %3436 = vrot.lane.b32.xlu0 %v4108_v14, %s4370_s5 }
0x14a1   :  { %3451 = vrot.lane.b32.xlu1 %v4108_v14, %s4371_s6 }
0x14a2   :  { %2231 = vrot.lane.b32.xlu0 %v4104_v25, %s4372_s8 }
0x14a5   :  { %2233 = vrot.lane.b32.xlu1 %v4120_v27, %s4372_s8 }
0x1508   :  { %v1739_v23 = vpop.xlane.xlu1 %1738 }
0x1509   :  { %v1736_v22 = vpop.xlane.xlu0 %1735 }
0x150a   :  { %3578 = vrcp.f32 %v1736_v22 }
0x150b   :  { %3580 = vrcp.f32 %v1739_v23 }
0x150d   :  { %v1936_v28 = vpop.xlane.xlu0 %1935 }
0x150e   :  { %3582 = vrcp.f32 %v1936_v28 }
0x1511   :  { %v1939_v29 = vpop.xlane.xlu1 %1938 }
0x1512   :  { %3584 = vrcp.f32 %v1939_v29 }
0x1514   :  { %v3579_v31 = vpop.eup %3578 }
0x1515   :  { %v2136_v32 = vpop.xlane.xlu0 %2135  ;;  %v1741_v35 = vmul.f32 %v3579_v31, %v3569_v11  ;;  %v2139_v36 = vpop.xlane.xlu1 %2138 }
0x1516   :  { %3586 = vrcp.f32 %v2136_v32  ;;  %v3581_v41 = vpop.eup %3580 }
0x1517   :  { %3191 = vmatprep.mubr.msk.f32.mxu0 %vm488_vm10, %v1741_v35  ;;  %3588 = vrcp.f32 %v2139_v36  ;;  %v1743_v45 = vmul.f32 %v3581_v41, %v3567_v10 }
0x1518   :  { %v3583_v24 = vpop.eup %3582 }
0x1519   :  { %v3437_v46 = vpop.permute.xlu0 %3436  ;;  %v3442_v25 = vpop.permute.xlu1 %3441  ;;  %v1941_v48 = vmul.f32 %v3583_v24, %v3571_v16 }
0x151a   :  { %v3439_v38 = vunpack.i.h.bf16 %v3437_v46  ;;  %v3438_v39 = vunpack.i.l.bf16 %v3437_v46  ;;  %v3444_v27 = vunpack.i.h.bf16 %v3442_v25  ;;  %v3443_v50 = vunpack.i.l.bf16 %v3442_v25 }
0x151c   :  { %v3310_v40 = vpack.c.bf16 %v3439_v38, %v3438_v39  ;;  %v3320_v42 = vpack.c.bf16 %v3444_v27, %v3443_v50  ;;  %v3585_v47 = vpop.eup %3584  ;;  %v3503_v38 = vld [vmem:[%s4335_s9 + $0x18] sm:$0xff]  }
0x151d   :  { %v3447_v43 = vpop.permute.xlu1 %3446  ;;  %v1943_v61 = vmul.f32 %v3585_v47, %v3573_v18  ;;  %v2232_v3 = vpop.permute.xlu0 %2231 }
0x151e   :  { %3311 = vmatprep.subr.bf16.mxu0 %v3310_v40  ;;  %v3449_v30 = vunpack.i.h.bf16 %v3447_v43  ;;  %v3448_v44 = vunpack.i.l.bf16 %v3447_v43 }
0x151f   :  { %3313 = vmatpush3.bf16.msra.mxu0 %v3310_v40 }
0x1520   :  { %3321 = vmatprep.subr.bf16.mxu0 %v3320_v42  ;;  %v3587_v52 = vpop.eup %3586  ;;  %v3330_v53 = vpack.c.bf16 %v3449_v30, %v3448_v44 }
0x1521   :  { %v3452_v26 = vpop.permute.xlu1 %3451  ;;  %v3589_v62 = vpop.eup %3588  ;;  %v2141_v0 = vmul.f32 %v3587_v52, %v3577_v55 }
0x1522   :  { %3192 = vmatmul.mubr.msk.f32.vlgmr.msra.gmra.mrb[18].mxu0 %vm488_vm10, %v1743_v45  ;;  %v3454_v54 = vunpack.i.h.bf16 %v3452_v26  ;;  %v3453_v60 = vunpack.i.l.bf16 %v3452_v26  ;;  %v2143_v2 = vmul.f32 %v3589_v62, %v4160_v20  ;;  %v2952_v62 = vld [vmem:[%s4336_s10 + $0x1] ss:$0 sm:$0xff] }
0x1523   :  { %3323 = vmatpush3.bf16.msra.mxu0 %v3320_v42  ;;  %3205 = vmatprep.mubr.msk.f32.mxu0 %vm488_vm10, %v1941_v48 }
0x1524   :  { %3331 = vmatprep.subr.bf16.mxu0 %v3330_v53  ;;  %v3334_v1 = vpack.c.bf16 %v3454_v54, %v3453_v60 }
0x1525   :  { %v2234_v4 = vpop.permute.xlu1 %2233 }
0x1526   :  { %3206 = vmatmul.mubr.msk.f32.vlgmr.msra.gmra.mrb[20].mxu0 %vm488_vm10, %v1943_v61 }
0x1527   :  { %3333 = vmatpush3.bf16.msra.mxu0 %v3330_v53  ;;  %3219 = vmatprep.mubr.msk.f32.mxu0 %vm488_vm10, %v2141_v0 }
0x1528   :  { %3336 = vmatprep.subr.msk.bf16.mxu0 %vm3892_vm4, %v3334_v1 }
0x152a   :  { %3220 = vmatmul.mubr.msk.f32.vlgmr.msra.gmra.mrb[22].mxu0 %vm488_vm10, %v2143_v2 }
0x152b   :  { %3226 = vmatprep.mubr.msk.f32.mxu0 %vm402_vm3, %v2232_v3 }
0x1530   :  { %3339 = vmatpush3.bf16.xpose.msk.msra.mxu0 %vm3892_vm4, %v3334_v1 }
0x1531   :  { %3244 = vmatprep.subr.bf16.mxu0 %v3661_v63 }
0x1537   :  { %3227 = vmatmul.mubr.msk.f32.vlgmr.msra.gmra.mrb[24].mxu0 %vm402_vm3, %v2234_v4 }
0x1538   :  { %3248 = vmatprep.mubr.msk.bf16.mxu0 %vm3662_vm2, %v3661_v63 }
0x15f5   :  { %v4193_v57 = vpop.f32.mrb[18].mxu0 }
0x15f6   :  { %v4195_v58 = vpop.f32.mrb[19].mxu0 }
0x15f9   :  { %v3207_v59 = vpop.f32.mrb[20].mxu0 }
0x15fa   :  { %v2022_v5 = vpop.f32.mrb[21].mxu0 }
0x15fb   :  { %v3460_v6 = vpack.i.bf16 %v3207_v59, %v2022_v5 }
0x15fd   :  { %v3221_v7 = vpop.f32.mrb[22].mxu0 }
0x15fe   :  { %v2222_v8 = vpop.f32.mrb[23].mxu0 }
0x15ff   :  { %v3465_v9 = vpack.i.bf16 %v3221_v7, %v2222_v8 }
0x160a   :  { %v3228_v34 = vpop.f32.mrb[24].mxu0 }
0x160b   :  { %v2319_v10 = vadd.f32 %v3228_v34, %v3908_v49  ;;  %v2313_v11 = vpop.f32.mrb[25].mxu0 }
0x160c   :  { %v2314_v12 = vadd.f32 %v2313_v11, %v3910_v51 }
0x160d   :  { %v2325_v13 = vsel %vm488_vm10, %v2319_v10, -inf }
0x160e   :  { %2326 = vmax.xlane.f32.xlu1 %v2325_v13  ;;  %v2322_v15 = vsel %vm488_vm10, %v2314_v12, -inf }
0x160f   :  { %2323 = vmax.xlane.f32.xlu0 %v2322_v15  ;;  %v3504_v15 = vld [vmem:[%s4339_s13 + $0x10] sm:$0xff]  }
0x1610   :  { %3245 = vmatpush3.bf16.msra.mxu0 %v3504_v15 }
0x1611   :  { %3246 = vmatprep.subr.bf16.mxu0 %v3661_v63 }
0x161f   :  { %3461 = vrot.lane.b32.xlu1 %v3460_v6, %s4373_s0 }
0x1623   :  { %3466 = vrot.lane.b32.xlu1 %v3465_v9, %s4374_s3 }
0x169b   :  { %v2327_v16 = vpop.xlane.xlu1 %2326 }
0x169c   :  { %v2329_v17 = vsub.f32 %v2319_v10, %v2327_v16  ;;  %v2324_v18 = vpop.xlane.xlu0 %2323  ;;  %v3505_v16 = vld [vmem:[%s4339_s13 + $0x18] sm:$0xff]  }
0x169d   :  { %v2328_v19 = vsub.f32 %v2314_v12, %v2324_v18  ;;  %3247 = vmatpush3.bf16.msra.mxu0 %v3505_v16 }
0x169e   :  { %v2332_v20 = vmul.f32 1.442695, %v2329_v17 }
0x169f   :  { %v2330_v55 = vmul.f32 1.442695, %v2328_v19  ;;  %v3462_v40 = vpop.permute.xlu1 %3461 }
0x16a0   :  { %3590 = vpow2.f32 %v2332_v20  ;;  %v3464_v24 = vunpack.i.h.bf16 %v3462_v40  ;;  %v3463_v42 = vunpack.i.l.bf16 %v3462_v40 }
0x16a1   :  { %3592 = vpow2.f32 %v2330_v55 }
0x16a2   :  { %v2456_v45 = vsel %vm402_vm3, %v4193_v57, %v3464_v24  ;;  %v2455_v47 = vsel %vm402_vm3, %v4195_v58, %v3463_v42 }
0x16a3   :  { %v3467_v41 = vpop.permute.xlu1 %3466 }
0x16a4   :  { %v3469_v43 = vunpack.i.h.bf16 %v3467_v41  ;;  %v3468_v30 = vunpack.i.l.bf16 %v3467_v41 }
0x16a6   :  { %v2457_v53 = vsel %vm488_vm10, %v2455_v47, %v3468_v30  ;;  %v2458_v26 = vsel %vm488_vm10, %v2456_v45, %v3469_v43 }
0x16aa   :  { %v3591_v49 = vpop.eup %3590 }
0x16ab   :  { %v2337_v51 = vsel %vm488_vm10, %v3591_v49, 0.0  ;;  %v3593_v56 = vpop.eup %3592 }
0x16ac   :  { %2338 = vadd.xlane.f32.xlu0 %v2337_v51  ;;  %v2334_v21 = vsel %vm488_vm10, %v3593_v56, 0.0 }
0x16b0   :  { %2335 = vadd.xlane.f32.xlu0 %v2334_v21  ;;  %v2958_v21 = vld [vmem:[%s4337_s11 + $0x1] ss:$0 sm:$0xff] }
0x16c6   :  { %3456 = vrot.lane.b32.xlu0 %v4108_v14, %s4375_s26  ;;  %v3502_v14 = vld [vmem:[%s4335_s9 + $0x10] sm:$0xff]  }
0x1739   :  { %v2339_v22 = vpop.xlane.xlu0 %2338 }
0x173a   :  { %3594 = vrcp.f32 %v2339_v22 }
0x173d   :  { %v2336_v23 = vpop.xlane.xlu0 %2335 }
0x173e   :  { %3596 = vrcp.f32 %v2336_v23 }
0x1741   :  { %v3457_v28 = vpop.permute.xlu0 %3456 }
0x1742   :  { %v3459_v29 = vunpack.i.h.bf16 %v3457_v28  ;;  %v3458_v31 = vunpack.i.l.bf16 %v3457_v28 }
0x1744   :  { %v3340_v32 = vpack.c.bf16 %v3459_v29, %v3458_v31  ;;  %v3595_v35 = vpop.eup %3594  ;;  %v2959_v29 = vld [vmem:[%s4338_s12 + $0x1] ss:$0 sm:$0xff] }
0x1745   :  { %v2343_v25 = vmul.f32 %v3595_v35, %v3591_v49 }
0x1746   :  { %3341 = vmatprep.subr.bf16.mxu1 %v3340_v32 }
0x1747   :  { %3343 = vmatpush3.bf16.msra.mxu1 %v3340_v32 }
0x1748   :  { %v3597_v36 = vpop.eup %3596  ;;  %3236 = vmatprep.subr.bf16.mxu1 %v3661_v63 }
0x1749   :  { %v2341_v46 = vmul.f32 %v3597_v36, %v3593_v56 }
0x174b   :  { %3233 = vmatprep.mubr.msk.f32.mxu1 %vm488_vm10, %v2341_v46  ;;  %v3506_v46 = vld [vmem:[%s4341_s15 + $0x20] sm:$0xff]  }
0x174c   :  { %3234 = vmatmul.mubr.msk.f32.vlgmr.msra.gmra.mrb[28].mxu1 %vm488_vm10, %v2343_v25  ;;  %v3507_v25 = vld [vmem:[%s4341_s15 + $0x28] sm:$0xff]  }
0x174d   :  { %3240 = vmatprep.mubr.msk.bf16.mxu1 %vm3662_vm2, %v3661_v63  ;;  %3237 = vmatpush3.bf16.msra.mxu1 %v3502_v14  ;;  %v3508_v14 = vld [vmem:[%s4341_s15 + $0x30] sm:$0xff]  }
0x174e   :  { %3238 = vmatprep.subr.bf16.mxu1 %v3661_v63 }
0x1751   :  { %3239 = vmatpush3.bf16.msra.mxu1 %v3503_v38  ;;  %v3509_v38 = vld [vmem:[%s4341_s15 + $0x38] sm:$0xff]  }
0x1752   :  { %3252 = vmatprep.subr.bf16.mxu1 %v3661_v63 }
0x181f   :  { %v3235_v39 = vpop.f32.mrb[28].mxu1 }
0x1820   :  { %v2422_v27 = vpop.f32.mrb[29].mxu1 }
0x1821   :  { %v3470_v50 = vpack.i.bf16 %v3235_v39, %v2422_v27  ;;  %v2965_v39 = vld [vmem:[%s4340_s14 + $0x1] ss:$0 sm:$0xff] }
0x1823   :  { %3471 = vrot.lane.b32.xlu1 %v3470_v50, %s4376_s23 }
0x1895   :  { %v3472_v44 = vpop.permute.xlu1 %3471 }
0x1896   :  { %v3474_v48 = vunpack.i.h.bf16 %v3472_v44  ;;  %v3473_v52 = vunpack.i.l.bf16 %v3472_v44 }
0x1898   :  { %v2460_v54 = vsel %vm1226_vm11, %v2458_v26, %v3474_v48  ;;  %v2459_v60 = vsel %vm1226_vm11, %v2457_v53, %v3473_v52 }
0x1899   :  { %v2461_v61 = vpack.c.bf16 %v2460_v54, %v2459_v60 }
0x189b   :  { %3241 = vmatmul.mubr.msk.bf16.vlgmr.msra.gmra.mrb[32].mxu1 %vm238_vm1, %v2461_v61 }
0x189c   :  { %3260 = vmatprep.mubr.msk.bf16.mxu1 %vm3662_vm2, %v3661_v63  ;;  %3253 = vmatpush3.bf16.msra.mxu1 %v3506_v46 }
0x189d   :  { %3254 = vmatprep.subr.bf16.mxu1 %v3661_v63 }
0x18a0   :  { %3255 = vmatpush3.bf16.msra.mxu1 %v3507_v25 }
0x18a1   :  { %3256 = vmatprep.subr.bf16.mxu1 %v3661_v63 }
0x18a4   :  { %3257 = vmatpush3.bf16.msra.mxu1 %v3508_v14 }
0x18a5   :  { %3258 = vmatprep.subr.bf16.mxu1 %v3661_v63 }
0x18a8   :  { %3259 = vmatpush3.bf16.msra.mxu1 %v3509_v38 }
0x196e   :  { %v2524_v0 = vpop.f32.mrb[32].mxu1 }
0x196f   :  { %v2525_v1 = vadd.f32 %v2952_v62, %v2524_v0  ;;  %v3242_v2 = vpop.f32.mrb[33].mxu1 }
0x1970   :  { %v2527_v3 = vpop.f32.mrb[34].mxu1 }
0x1971   :  { %v4236_v4 = vadd.f32 %v2525_v1, %v4074_v33  ;;  %v2528_v57 = vadd.f32 %v2952_v62, %v2527_v3  ;;  %v3243_v58 = vpop.f32.mrb[35].mxu1  ;;  %v2980_v62 = vld [vmem:[%s4342_s16 + $0x1] ss:$0 sm:$0xff]  ;;  %s3678_s16 = smov [#allocation2]  }
0x1972   :  { %s2820_s29 = sshll.u32 %s3678_s16, 4  ;;  %s2821_s29 = int_to_ptr.vmem [resolvable:$true] %s2820_s29 }
0x1973   :  { %v4239_v59 = vadd.f32 %v2528_v57, %v4077_v37  ;;  %v2537_v5 = vsel %vm238_vm1, %v4236_v4, 0.0  ;;  %s3612_s30 = scalar_lea.vmem %s2821_s29, 256  ;;  %p3617_p1 = scmp.lt.s32.totalorder %s2821_s29, %s2821_s29 }
0x1974   :  { %2538 = vadd.xlane.f32.xlu0 %v2537_v5  ;;  %p3613_p0 = scmp.ne.s32.totalorder %s2821_s29, %s3612_s30  ;;  %p3618_p2 = scmp.lt.s32.totalorder %s3612_s30, %s3612_s30 }
0x1975   :  { %v2540_v6 = vsel %vm238_vm1, %v4239_v59, 0.0 }
0x1976   :  { %2541 = vadd.xlane.f32.xlu1 %v2540_v6  ;;  %p3619_p3 = por %p3618_p2, %p3617_p1 }
0x1978   :  { %p3620_p4 = pnand %p3619_p3, %p3613_p0 }
0x1a01   :  { %v2539_v7 = vpop.xlane.xlu0 %2538 }
0x1a02   :  { %v2543_v8 = vmul.f32 0.03125, %v2539_v7 }
0x1a03   :  { %v2542_v9 = vpop.xlane.xlu1 %2541 }
0x1a04   :  { %v2545_v34 = vsub.f32 %v4236_v4, %v2543_v8  ;;  %v2544_v33 = vmul.f32 0.03125, %v2542_v9 }
0x1a06   :  { %v2546_v10 = vsub.f32 %v4239_v59, %v2544_v33  ;;  %v2547_v11 = vmul.f32 %v2545_v34, %v2545_v34 }
0x1a08   :  { %v2549_v37 = vsel %vm238_vm1, %v2547_v11, 0.0  ;;  %v2548_v12 = vmul.f32 %v2546_v10, %v2546_v10 }
0x1a09   :  { %2550 = vadd.xlane.f32.xlu0 %v2549_v37 }
0x1a0a   :  { %v2552_v13 = vsel %vm238_vm1, %v2548_v12, 0.0 }
0x1a0d   :  { %2553 = vadd.xlane.f32.xlu0 %v2552_v13 }
0x1a96   :  { %v2551_v17 = vpop.xlane.xlu0 %2550 }
0x1a97   :  { %v2555_v18 = vmul.f32 0.03125, %v2551_v17 }
0x1a99   :  { %v2557_v19 = vadd.f32 1e-05, %v2555_v18 }
0x1a9a   :  { %v2554_v20 = vpop.xlane.xlu0 %2553 }
0x1a9b   :  { %3598 = vrsqrt.f32 %v2557_v19  ;;  %v2556_v55 = vmul.f32 0.03125, %v2554_v20 }
0x1a9d   :  { %v2558_v49 = vadd.f32 1e-05, %v2556_v55 }
0x1a9f   :  { %3600 = vrsqrt.f32 %v2558_v49 }
0x1aa5   :  { %v3599_v51 = vpop.eup %3598 }
0x1aa6   :  { %v2561_v56 = vmul.f32 %v3599_v51, %v2545_v34 }
0x1aa8   :  { %v2569_v23 = vmul.f32 %v2958_v21, %v2561_v56 }
0x1aa9   :  { %v3601_v22 = vpop.eup %3600 }
0x1aaa   :  { %v2562_v28 = vmul.f32 %v3601_v22, %v2546_v10  ;;  %v2577_v32 = vadd.f32 %v2959_v29, %v2569_v23 }
0x1aac   :  { %v2570_v31 = vmul.f32 %v2958_v21, %v2562_v28 }
0x1aae   :  { %v2578_v35 = vadd.f32 %v2959_v29, %v2570_v31 }
0x1ab0   :  { %v2579_v36 = vpack.c.bf16 %v2578_v35, %v2577_v32 }
0x1ab2   :  { %3249 = vmatmul.mubr.msk.bf16.vlgmr.msra.gmra.mrb[28].mxu0 %vm238_vm1, %v2579_v36 }
0x1b85   :  { %v2642_v27 = vpop.f32.mrb[28].mxu0 }
0x1b86   :  { %v2643_v50 = vadd.f32 %v2965_v39, %v2642_v27  ;;  %v3250_v40 = vpop.f32.mrb[29].mxu0 }
0x1b87   :  { %v2645_v41 = vpop.f32.mrb[30].mxu0 }
0x1b88   :  { %v2969_v24 = vmul.f32 -1.702, %v2643_v50  ;;  %v2646_v42 = vadd.f32 %v2965_v39, %v2645_v41  ;;  %v3251_v43 = vpop.f32.mrb[31].mxu0 }
0x1b8a   :  { %v2653_v30 = vmul.f32 1.442695, %v2969_v24  ;;  %v2970_v44 = vmul.f32 -1.702, %v2646_v42 }
0x1b8c   :  { %3602 = vpow2.f32 %v2653_v30  ;;  %v2655_v63 = vmul.f32 1.442695, %v2970_v44 }
0x1b8e   :  { %3604 = vpow2.f32 %v2655_v63 }
0x1b96   :  { %v3603_v45 = vpop.eup %3602 }
0x1b97   :  { %v2657_v47 = vadd.f32 1.0, %v3603_v45 }
0x1b98   :  { %v3605_v48 = vpop.eup %3604 }
0x1b99   :  { %3606 = vrcp.f32 %v2657_v47  ;;  %v2658_v52 = vadd.f32 1.0, %v3605_v48 }
0x1b9b   :  { %3608 = vrcp.f32 %v2658_v52 }
0x1ba3   :  { %v3607_v53 = vpop.eup %3606 }
0x1ba4   :  { %v2663_v54 = vmul.f32 %v3607_v53, %v2643_v50 }
0x1ba5   :  { %v3609_v26 = vpop.eup %3608 }
0x1ba6   :  { %v2664_v60 = vmul.f32 %v3609_v26, %v2646_v42 }
0x1ba8   :  { %v2665_v61 = vpack.c.bf16 %v2664_v60, %v2663_v54 }
0x1baa   :  { %3261 = vmatmul.mubr.msk.bf16.vlgmr.msra.gmra.mrb[36].mxu1 %vm191_vm0, %v2665_v61 }
0x1c7d   :  { %v2744_v0 = vpop.f32.mrb[36].mxu1 }
0x1c7e   :  { %v2745_v1 = vadd.f32 %v2980_v62, %v2744_v0  ;;  %v3262_v2 = vpop.f32.mrb[37].mxu1 }
0x1c7f   :  { %v2747_v3 = vpop.f32.mrb[38].mxu1 }
0x1c80   :  { %v2751_v57 = vadd.f32 %v2745_v1, %v4236_v4  ;;  %v2748_v58 = vadd.f32 %v2980_v62, %v2747_v3  ;;  %v3263_v5 = vpop.f32.mrb[39].mxu1 }
0x1c82   :  { %2753 = vst.msk [vmem:[#allocation2] sm:$0xff] %vm238_vm1, %v2751_v57  ;;  %v2752_v6 = vadd.f32 %v2748_v58, %v4239_v59 }
0x1c84   :  { %2754 = vst.msk [vmem:[#allocation2 + $0x8] sm:$0xff] %vm238_vm1, %v2752_v6  ;;  %v2759_v7 = vrot.slane %v2752_v6, 7 }
0x1c86   :  { %v2761_v8 = vsel %vm2760_vm12, %v2759_v7, %v2751_v57 }
0x1c87   :  { %v2764_v9 = vsel %vm2763_vm13, %v2761_v8, 0.0 }
0x1c88   :  { %2765 = vadd.xlane.f32.xlu0 %v2764_v9 }
0x1d15   :  { %v2766_v34 = vpop.xlane.xlu0 %2765 }
0x1d16   :  { %v2767_v33 = vmul.f32 0.03125, %v2766_v34 }
0x1d18   :  { %v2769_v10 = vrot.slane %v2767_v33, 1  ;;  %v2772_v4 = vsub.f32 %v2751_v57, %v2767_v33 }
0x1d1a   :  { %v2773_v11 = vsub.f32 %v2752_v6, %v2769_v10  ;;  %v2774_v12 = vmul.f32 %v2772_v4, %v2772_v4 }
0x1d1c   :  { %v2775_v37 = vmul.f32 %v2773_v11, %v2773_v11 }
0x1d1e   :  { %v2778_v13 = vrot.slane %v2775_v37, 7 }
0x1d20   :  { %v2779_v59 = vsel %vm2760_vm12, %v2778_v13, %v2774_v12 }
0x1d21   :  { %v2781_v15 = vsel %vm2763_vm13, %v2779_v59, 0.0 }
0x1d22   :  { %2782 = vadd.xlane.f32.xlu1 %v2781_v15 }
0x1d23   :  { %3623 = shalt.err (!%p3620_p4)
}
0x1d24   :  { %s3624_s22 = scalar_lea.hbm %s4345_s19, 256 }
0x1d25   :  { %p3625_p5 = scmp.ne.s32.totalorder %s4345_s19, %s3624_s22  ;;  %p3628_p6 = scmp.lt.u32.totalorder %s3624_s22, %s4345_s19 }
0x1d27   :  { %p3630_p7 = pnand %p3628_p6, %p3625_p5 }
0x1d29   :  { %3633 = shalt.err (!%p3630_p7)
}
0x1d2a   :  { %s3679_s7 = smov 128   ;;  %v2986_v49 = vld [vmem:[%s4343_s17] ss:$0 sm:$0xff] }
0x1d2b   :  { %2826 = dma.vmem_to_hbm [thread:$0]  %s2821_s29, 256, %s4345_s19, [#allocation3], %s3679_s7, %s3679_s7, %s4373_s0  }
0x1d2c   :  { %v2987_v22 = vld [vmem:[%s4344_s18] ss:$0 sm:$0xff]  ;;  %s3680_s19 = smov [#allocation4]  }
0x1d2d   :  { %s2833_s0 = sshll.u32 %s3680_s19, 4  ;;  %s2834_s0 = int_to_ptr.vmem [resolvable:$true] %s2833_s0 }
0x1d2e   :  { %s3634_s6 = scalar_lea.vmem %s2834_s0, 32  ;;  %p3639_p9 = scmp.lt.s32.totalorder %s2834_s0, %s2834_s0 }
0x1d2f   :  { %p3635_p8 = scmp.ne.s32.totalorder %s2834_s0, %s3634_s6  ;;  %p3640_p10 = scmp.lt.s32.totalorder %s3634_s6, %s3634_s6 }
0x1d31   :  { %p3641_p11 = por %p3640_p10, %p3639_p9 }
0x1d33   :  { %p3642_p12 = pnand %p3641_p11, %p3635_p8 }
0x1daf   :  { %v2783_v16 = vpop.xlane.xlu1 %2782 }
0x1db0   :  { %v2784_v17 = vmul.f32 0.03125, %v2783_v16 }
0x1db2   :  { %v2785_v18 = vadd.f32 1e-05, %v2784_v17 }
0x1db4   :  { %3610 = vrsqrt.f32 %v2785_v18 }
0x1dbe   :  { %v3611_v19 = vpop.eup %3610 }
0x1dbf   :  { %v2788_v20 = vrot.slane %v3611_v19, 1  ;;  %v2791_v55 = vmul.f32 %v3611_v19, %v2772_v4 }
0x1dc1   :  { %v2792_v51 = vmul.f32 %v2788_v20, %v2773_v11  ;;  %v2799_v56 = vmul.f32 %v2986_v49, %v2791_v55 }
0x1dc3   :  { %v2800_v21 = vmul.f32 %v2986_v49, %v2792_v51  ;;  %v2807_v28 = vadd.f32 %v2987_v22, %v2799_v56 }
0x1dc5   :  { %v2808_v23 = vadd.f32 %v2987_v22, %v2800_v21 }
0x1dc7   :  { %v2811_v29 = vrot.slane %v2808_v23, 7 }
0x1dc9   :  { %v2812_v31 = vsel %vm2760_vm12, %v2811_v29, %v2807_v28 }
0x1dca   :  { %2814 = vst.msk [vmem:[#allocation4] sm:$0x3] %vm2763_vm13, %v2812_v31 }
0x1dcb   :  { %3645 = shalt.err (!%p3642_p12)
}
0x1dcc   :  { %s3646_s18 = scalar_lea.hbm %s4346_s20, 32 }
0x1dcd   :  { %p3647_p13 = scmp.ne.s32.totalorder %s4346_s20, %s3646_s18  ;;  %p3650_p0 = scmp.lt.u32.totalorder %s3646_s18, %s4346_s20 }
0x1dcf   :  { %p3652_p1 = pnand %p3650_p0, %p3647_p13 }
0x1dd1   :  { %3655 = shalt.err (!%p3652_p1)
}
0x1dd2   :  { %2836 = dma.vmem_to_hbm [thread:$0]  %s2834_s0, 32, %s4346_s20, [#allocation5]  }
0x1dd3   :  { %3656 = dma.done.wait [#allocation3], 256  }
0x1dd4   :  { %3657 = vsyncadd [#allocation3], 4294967040 }
0x1dd5   :  { %3658 = dma.done.wait [#allocation5], 32  }
0x1dd6   :  { %3659 = vsyncadd [#allocation5], 4294967264 }
0x1dd7   :  { %2843 = vsyncpa [#allocation3], 1 }
0x1dd8   :  { %2844 = vsyncpa [#allocation5], 1 }

</bundles_post_ra>
